<compile_context>
chip_gen: v7x
topology: tpu7x:2x2x1
jax: 0.10.0
libtpu: 0.0.40
codegen_flags: <defaults>
</compile_context>

<pallas_src>
import functools

import jax
import jax.numpy as jnp
from jax.experimental import pallas as pl
from jax.experimental.pallas import tpu as pltpu

BN_EPS = 1e-5      # nn.BatchNorm1d default eps
NORM_EPS = 1e-12   # norm() clamp(min=eps)


# ----------------------------------------------------------------------------
# Kernel 1: 3x3 conv (as one fused im2col matmul) -> ReLU -> global-average-pool.
# Grid: (feat blocks [parallel], H row-tiles [arbitrary / reduction]).
# ----------------------------------------------------------------------------
def _conv_gap_kernel(p_ref, w_ref, b_ref, out_ref, *, inv_hw):
    # TODO(synk): the pretrained ResNet-34 backbone cannot be reproduced without a
    # checkpoint; it is replaced by a deterministic conv3x3+ReLU+GAP surrogate that
    # produces the same (N, 512, 1, 1)->view(N, 512) feature shape.
    i = pl.program_id(1)

    @pl.when(i == 0)
    def _init():
        out_ref[...] = jnp.zeros_like(out_ref)

    n, th, w, kp = p_ref.shape
    tf = w_ref.shape[-1]
    m = n * th * w                                   # batch folded into MXU M dim

    patches = p_ref[...].reshape(m, kp)              # bf16, lane-dense K (27->32)
    acc = jnp.dot(patches, w_ref[...], preferred_element_type=jnp.float32)
    conv = jnp.maximum(acc + b_ref[...], 0.0)        # bias + ReLU, f32 (m, tf)

    # per-image spatial partial sum, accumulated across the H reduction axis
    out_ref[...] += jnp.sum(conv.reshape(n, th * w, tf), axis=1)

    @pl.when(i == pl.num_programs(1) - 1)
    def _finalize():
        out_ref[...] *= inv_hw                       # global average pool


# ----------------------------------------------------------------------------
# Kernel 2: dense tail on the (N, 512) feature vector.
# visual_embedding: BN(512) -> Linear(512,1024) -> Tanh
# align:            Linear(1024, embDim)
# align_img:        BN(embDim) -> Tanh
# norm():           row-wise L2 normalization, clamp(min=1e-12)
# ----------------------------------------------------------------------------
def _dense_tail_kernel(f_ref, g1_ref, be1_ref, rm1_ref, rv1_ref, w1_ref, b1_ref,
                       w2_ref, b2_ref, g2_ref, be2_ref, rm2_ref, rv2_ref, out_ref):
    feat = f_ref[...]                                                   # (N, 512) f32

    # BatchNorm1d(512), eval-mode running stats (matches PyTorch inference).
    xb = (feat - rm1_ref[...]) * jax.lax.rsqrt(rv1_ref[...] + BN_EPS) \
         * g1_ref[...] + be1_ref[...]
    h1 = jnp.tanh(jnp.dot(xb.astype(jnp.bfloat16), w1_ref[...],
                          preferred_element_type=jnp.float32) + b1_ref[...])

    h2 = jnp.dot(h1.astype(jnp.bfloat16), w2_ref[...],
                 preferred_element_type=jnp.float32) + b2_ref[...]

    y = jnp.tanh((h2 - rm2_ref[...]) * jax.lax.rsqrt(rv2_ref[...] + BN_EPS)
                 * g2_ref[...] + be2_ref[...])

    # y / clamp(||y||_2, 1e-12)  ==  y * rsqrt(max(sum(y^2), eps^2))
    ss = jnp.sum(y * y, axis=1, keepdims=True)
    out_ref[...] = y * jax.lax.rsqrt(jnp.maximum(ss, NORM_EPS * NORM_EPS))


# ----------------------------------------------------------------------------
# Wrapper helpers.
# ----------------------------------------------------------------------------
def _pick_row_tile(h, requested):
    """Largest divisor of h that is <= requested (never silently fall back to h)."""
    if requested is None:
        return h
    requested = max(1, min(int(requested), h))
    for th in range(requested, 0, -1):
        if h % th == 0:
            return th
    return h


def _conv_vmem_limit(n, th, w, kp, tf):
    """Per-step VMEM estimate: double-buffered blocks + ~3x (m, tf) f32 temps."""
    patches_blk = 2 * n * th * w * kp * 2            # bf16, double-buffered
    weight_blk = 2 * (kp * tf * 2 + tf * 4)          # wconv bf16 + bconv f32
    out_blk = 2 * n * tf * 4
    interm = 3 * n * th * w * tf * 4                 # acc + conv + reduce temp
    est = patches_blk + weight_blk + out_blk + interm + (4 << 20)
    # Clamp to 64 MiB so the same limit is valid on v5e/v6e (128 MiB) and v7x (64 MiB).
    return int(min(max(est, 16 << 20), 64 << 20))


def init_params(key, in_ch=3, feat_dim=512, hidden=1024, emb_dim=128):
    """Deterministic synthetic parameters (shapes follow the PyTorch module)."""
    ks = jax.random.split(key, 6)
    return dict(
        # surrogate backbone 3x3 conv, stored per-tap: (9, C, 512)
        wconv=jax.random.normal(ks[0], (9, in_ch, feat_dim), jnp.float32) * 0.1,
        bconv=jax.random.normal(ks[1], (1, feat_dim), jnp.float32) * 0.01,
        # visual_embedding: BatchNorm1d(512) (affine + running stats) + Linear(512, 1024)
        g1=jnp.ones((1, feat_dim), jnp.float32),
        be1=jnp.zeros((1, feat_dim), jnp.float32),
        rm1=jnp.zeros((1, feat_dim), jnp.float32),
        rv1=jnp.ones((1, feat_dim), jnp.float32),
        w1=jax.random.normal(ks[2], (feat_dim, hidden), jnp.float32) * (feat_dim ** -0.5),
        b1=jax.random.normal(ks[3], (1, hidden), jnp.float32) * 0.01,
        # align: Linear(1024, embDim)
        w2=jax.random.normal(ks[4], (hidden, emb_dim), jnp.float32) * (hidden ** -0.5),
        b2=jax.random.normal(ks[5], (1, emb_dim), jnp.float32) * 0.01,
        # align_img: BatchNorm1d(embDim) affine + running stats
        g2=jnp.ones((1, emb_dim), jnp.float32),
        be2=jnp.zeros((1, emb_dim), jnp.float32),
        rm2=jnp.zeros((1, emb_dim), jnp.float32),
        rv2=jnp.ones((1, emb_dim), jnp.float32),
    )


@functools.partial(jax.jit, static_argnames=("row_tile", "feat_block"))
def food_space_image_encoder(x_nchw, params, row_tile=8, feat_block=256):
    n, c, h, w = x_nchw.shape
    wconv = params["wconv"]
    feat = wconv.shape[-1]
    kc = 9 * c
    kp = ((kc + 31) // 32) * 32                      # lane-dense K: 27 -> 32 for C=3

    # --- wrapper-side im2col (single jit region: transpose + pad + gather + cast
    #     fuse inside XLA; negligible HBM traffic since the kernel is compute-bound).
    x = jnp.transpose(x_nchw, (0, 2, 3, 1))                            # NHWC f32
    xpad = jnp.pad(x, ((0, 0), (1, 1), (1, 1), (0, 0)))
    taps = [xpad[:, di:di + h, dj:dj + w, :] for di in range(3) for dj in range(3)]
    patches = jnp.concatenate(taps, axis=-1)                           # (N, H, W, 9C)
    patches = jnp.pad(patches, ((0, 0), (0, 0), (0, 0), (0, kp - kc)))
    patches = patches.astype(jnp.bfloat16)

    # conv weights: (9, C, F) -> (KP, F) bf16, K zero-padded to match the patches.
    wconv_k = jnp.pad(wconv.reshape(kc, feat),
                      ((0, kp - kc), (0, 0))).astype(jnp.bfloat16)

    th = _pick_row_tile(h, row_tile)                 # H reduction tile (valid divisor)
    tf = feat_block if (feat_block and feat % feat_block == 0) else feat
    grid = (feat // tf, h // th)                     # (parallel feat, arbitrary rows)

    conv_flops = 2 * n * h * w * kp * feat
    conv_bytes = patches.size * 2 + wconv_k.size * 2 + params["bconv"].size * 4 + n * feat * 4

    feat_gap = pl.pallas_call(
        functools.partial(_conv_gap_kernel, inv_hw=1.0 / float(h * w)),
        out_shape=jax.ShapeDtypeStruct((n, feat), jnp.float32),
        grid_spec=pltpu.PrefetchScalarGridSpec(
            num_scalar_prefetch=0,
            grid=grid,
            in_specs=[
                pl.BlockSpec((n, th, w, kp), lambda f, i: (0, i, 0, 0)),   # patches tile
                pl.BlockSpec((kp, tf), lambda f, i: (0, f)),               # conv weights
                pl.BlockSpec((1, tf), lambda f, i: (0, f)),                # conv bias
            ],
            out_specs=pl.BlockSpec((n, tf), lambda f, i: (0, f)),          # GAP accumulator
        ),
        compiler_params=pltpu.CompilerParams(
            dimension_semantics=("parallel", "arbitrary"),
            vmem_limit_bytes=_conv_vmem_limit(n, th, w, kp, tf),
        ),
        cost_estimate=pl.CostEstimate(flops=conv_flops, transcendentals=0,
                                      bytes_accessed=conv_bytes),
    )(patches, wconv_k, params["bconv"])

    # --- tiny dense tail: single-step pallas_call, everything VMEM-resident.
    w1 = params["w1"].astype(jnp.bfloat16)
    w2 = params["w2"].astype(jnp.bfloat16)
    emb = w2.shape[-1]

    return pl.pallas_call(
        _dense_tail_kernel,
        out_shape=jax.ShapeDtypeStruct((n, emb), jnp.float32),
    )(feat_gap, params["g1"], params["be1"], params["rm1"], params["rv1"],
      w1, params["b1"], w2, params["b2"],
      params["g2"], params["be2"], params["rm2"], params["rv2"])


# ----------------------------------------------------------------------------
# Pure-JAX reference (f32) for a numerical sanity check.
# ----------------------------------------------------------------------------
def _reference(x_nchw, params):
    n, c, h, w = x_nchw.shape
    x = jnp.transpose(x_nchw, (0, 2, 3, 1))
    xpad = jnp.pad(x, ((0, 0), (1, 1), (1, 1), (0, 0)))
    taps = [xpad[:, di:di + h, dj:dj + w, :] for di in range(3) for dj in range(3)]
    patches = jnp.concatenate(taps, axis=-1)                           # (N, H, W, 9C)
    wk = params["wconv"].reshape(9 * c, -1)
    conv = jnp.maximum(jnp.einsum("nhwk,kf->nhwf", patches, wk) + params["bconv"], 0.0)
    feat = jnp.mean(conv, axis=(1, 2))
    xb = (feat - params["rm1"]) * jax.lax.rsqrt(params["rv1"] + BN_EPS) \
         * params["g1"] + params["be1"]
    h1 = jnp.tanh(xb @ params["w1"] + params["b1"])
    h2 = h1 @ params["w2"] + params["b2"]
    y = jnp.tanh((h2 - params["rm2"]) * jax.lax.rsqrt(params["rv2"] + BN_EPS)
                 * params["g2"] + params["be2"])
    nrm = jnp.sqrt(jnp.sum(y * y, axis=1, keepdims=True))
    return y / jnp.maximum(nrm, NORM_EPS)


if __name__ == "__main__":
    key = jax.random.PRNGKey(0)
    kx, kparams = jax.random.split(key)
    # PyTorch-style NCHW image input (small: batch=2, 3 channels, 16x16 spatial)
    x = jax.random.normal(kx, (2, 3, 16, 16), jnp.float32)
    params = init_params(kparams, in_ch=3, feat_dim=512, hidden=1024, emb_dim=128)

    out = food_space_image_encoder(x, params, row_tile=8, feat_block=256)
    out = jax.block_until_ready(out)

    assert out.shape == (2, 128), out.shape
    # rows must be unit L2-norm after norm()
    row_norms = jnp.sqrt(jnp.sum(out * out, axis=1))
    assert bool(jnp.all(jnp.abs(row_norms - 1.0) < 1e-4))
    # numerical check against the f32 pure-JAX reference (bf16 MXU tolerance)
    ref = _reference(x, params)
    assert bool(jnp.max(jnp.abs(out - ref)) < 2e-2)
    print("KERNEL_OK")
</pallas_src>

<mosaic_0001>
module attributes {stable_mosaic.version = 11 : i64} {
  func.func @_conv_gap_kernel(%arg0: i32, %arg1: i32, %arg2: memref<2x8x16x32xbf16, #tpu.memory_space<vmem>>, %arg3: memref<32x256xbf16, #tpu.memory_space<vmem>>, %arg4: memref<1x256xf32, #tpu.memory_space<vmem>>, %arg5: memref<2x256xf32, #tpu.memory_space<vmem>>) attributes {dimension_semantics = [#tpu.dimension_semantics<parallel>, #tpu.dimension_semantics<arbitrary>], iteration_bounds = array<i64: 2, 2>, scalar_prefetch = 0 : i64, scratch_operands = 0 : i64, tpu.core_type = #tpu.core_type<tc>, window_params = [{transform_indices = @transform_0, window_bounds = array<i64: 2, 8, 16, 32>}, {transform_indices = @transform_1, window_bounds = array<i64: 32, 256>}, {transform_indices = @transform_2, window_bounds = array<i64: 1, 256>}, {transform_indices = @transform_3, window_bounds = array<i64: 2, 256>}]} {
    %c0_i32 = arith.constant 0 : i32
    %0 = arith.cmpi eq, %arg1, %c0_i32 : i32
    %1 = arith.extui %0 : i1 to i32
    %c0_i32_0 = arith.constant 0 : i32
    %2 = arith.cmpi ne, %1, %c0_i32_0 : i32
    scf.if %2 {
      %cst_15 = arith.constant 0.000000e+00 : f32
      %20 = vector.broadcast %cst_15 : f32 to vector<2x256xf32>
      %c0_16 = arith.constant 0 : index
      %c0_17 = arith.constant 0 : index
      %21 = vector.load %arg5[%c0_16, %c0_17] : memref<2x256xf32, #tpu.memory_space<vmem>>, vector<2x256xf32>
      tpu.vector_store %arg5[%c0_16, %c0_17], %20 {strides = array<i32>} : memref<2x256xf32, #tpu.memory_space<vmem>>, vector<2x256xf32>,
    } else {
    }
    %c0 = arith.constant 0 : index
    %c0_1 = arith.constant 0 : index
    %c0_2 = arith.constant 0 : index
    %c0_3 = arith.constant 0 : index
    %3 = vector.load %arg2[%c0, %c0_1, %c0_2, %c0_3] : memref<2x8x16x32xbf16, #tpu.memory_space<vmem>>, vector<2x8x16x32xbf16>
    %4 = vector.shape_cast %3 : vector<2x8x16x32xbf16> to vector<256x32xbf16>
    %c0_4 = arith.constant 0 : index
    %c0_5 = arith.constant 0 : index
    %5 = vector.load %arg3[%c0_4, %c0_5] : memref<32x256xbf16, #tpu.memory_space<vmem>>, vector<32x256xbf16>
    %cst = arith.constant dense<0.000000e+00> : vector<256x256xf32>
    %6 = tpu.matmul %4, %5, %cst {dimension_numbers = #tpu.dot_dimension_numbers<[1], [0], [0], [1], [0, 0, 1, 1], [], []>} : vector<256x32xbf16>, vector<32x256xbf16>, vector<256x256xf32> -> vector<256x256xf32>
    %c0_6 = arith.constant 0 : index
    %c0_7 = arith.constant 0 : index
    %7 = vector.load %arg4[%c0_6, %c0_7] : memref<1x256xf32, #tpu.memory_space<vmem>>, vector<1x256xf32>
    %8 = vector.broadcast %7 : vector<1x256xf32> to vector<256x256xf32>
    %9 = arith.addf %6, %8 : vector<256x256xf32>
    %cst_8 = arith.constant 0.000000e+00 : f32
    %10 = vector.broadcast %cst_8 : f32 to vector<256x256xf32>
    %11 = arith.maximumf %9, %10 : vector<256x256xf32>
    %c0_9 = arith.constant 0 : index
    %c0_10 = arith.constant 0 : index
    %12 = vector.load %arg5[%c0_9, %c0_10] : memref<2x256xf32, #tpu.memory_space<vmem>>, vector<2x256xf32>
    %13 = vector.shape_cast %11 : vector<256x256xf32> to vector<2x128x256xf32>
    %cst_11 = arith.constant dense<0.000000e+00> : vector<2x256xf32>
    %14 = vector.multi_reduction <add>, %13, %cst_11 [1] : vector<2x128x256xf32> to vector<2x256xf32>
    %15 = arith.addf %12, %14 : vector<2x256xf32>
    %c0_12 = arith.constant 0 : index
    %c0_13 = arith.constant 0 : index
    %16 = vector.load %arg5[%c0_12, %c0_13] : memref<2x256xf32, #tpu.memory_space<vmem>>, vector<2x256xf32>
    tpu.vector_store %arg5[%c0_12, %c0_13], %15 {strides = array<i32>} : memref<2x256xf32, #tpu.memory_space<vmem>>, vector<2x256xf32>,
    %c1_i32 = arith.constant 1 : i32
    %17 = arith.cmpi eq, %arg1, %c1_i32 : i32
    %18 = arith.extui %17 : i1 to i32
    %c0_i32_14 = arith.constant 0 : i32
    %19 = arith.cmpi ne, %18, %c0_i32_14 : i32
    scf.if %19 {
      %c0_15 = arith.constant 0 : index
      %c0_16 = arith.constant 0 : index
      %20 = vector.load %arg5[%c0_15, %c0_16] : memref<2x256xf32, #tpu.memory_space<vmem>>, vector<2x256xf32>
      %cst_17 = arith.constant 3.906250e-03 : f32
      %21 = vector.broadcast %cst_17 : f32 to vector<2x256xf32>
      %22 = arith.mulf %20, %21 : vector<2x256xf32>
      %c0_18 = arith.constant 0 : index
      %c0_19 = arith.constant 0 : index
      %23 = vector.load %arg5[%c0_18, %c0_19] : memref<2x256xf32, #tpu.memory_space<vmem>>, vector<2x256xf32>
      tpu.vector_store %arg5[%c0_18, %c0_19], %22 {strides = array<i32>} : memref<2x256xf32, #tpu.memory_space<vmem>>, vector<2x256xf32>,
    } else {
    }
    return
  }
  func.func @transform_0(%arg0: i32, %arg1: i32) -> (i32, i32, i32, i32) {
    %c0_i32 = arith.constant 0 : i32
    %c0_i32_0 = arith.constant 0 : i32
    %c0_i32_1 = arith.constant 0 : i32
    %c0_i32_2 = arith.constant 0 : i32
    return %c0_i32, %arg1, %c0_i32_0, %c0_i32_1 : i32, i32, i32, i32
  }
  func.func @transform_1(%arg0: i32, %arg1: i32) -> (i32, i32) {
    %c0_i32 = arith.constant 0 : i32
    %c0_i32_0 = arith.constant 0 : i32
    return %c0_i32, %arg0 : i32, i32
  }
  func.func @transform_2(%arg0: i32, %arg1: i32) -> (i32, i32) {
    %c0_i32 = arith.constant 0 : i32
    %c0_i32_0 = arith.constant 0 : i32
    return %c0_i32, %arg0 : i32, i32
  }
  func.func @transform_3(%arg0: i32, %arg1: i32) -> (i32, i32) {
    %c0_i32 = arith.constant 0 : i32
    %c0_i32_0 = arith.constant 0 : i32
    return %c0_i32, %arg0 : i32, i32
  }
}

module attributes {stable_mosaic.version = 11 : i64} {
  func.func @_dense_tail_kernel(%arg0: memref<2x512xf32, #tpu.memory_space<vmem>>, %arg1: memref<1x512xf32, #tpu.memory_space<vmem>>, %arg2: memref<1x512xf32, #tpu.memory_space<vmem>>, %arg3: memref<1x512xf32, #tpu.memory_space<vmem>>, %arg4: memref<1x512xf32, #tpu.memory_space<vmem>>, %arg5: memref<512x1024xbf16, #tpu.memory_space<vmem>>, %arg6: memref<1x1024xf32, #tpu.memory_space<vmem>>, %arg7: memref<1024x128xbf16, #tpu.memory_space<vmem>>, %arg8: memref<1x128xf32, #tpu.memory_space<vmem>>, %arg9: memref<1x128xf32, #tpu.memory_space<vmem>>, %arg10: memref<1x128xf32, #tpu.memory_space<vmem>>, %arg11: memref<1x128xf32, #tpu.memory_space<vmem>>, %arg12: memref<1x128xf32, #tpu.memory_space<vmem>>, %arg13: memref<2x128xf32, #tpu.memory_space<vmem>>) attributes {dimension_semantics = [], scalar_prefetch = 0 : i64, scratch_operands = 0 : i64, tpu.core_type = #tpu.core_type<tc>} {
    %c0 = arith.constant 0 : index
    %c0_0 = arith.constant 0 : index
    %0 = vector.load %arg0[%c0, %c0_0] : memref<2x512xf32, #tpu.memory_space<vmem>>, vector<2x512xf32>
    %c0_1 = arith.constant 0 : index
    %c0_2 = arith.constant 0 : index
    %1 = vector.load %arg3[%c0_1, %c0_2] : memref<1x512xf32, #tpu.memory_space<vmem>>, vector<1x512xf32>
    %2 = vector.broadcast %1 : vector<1x512xf32> to vector<2x512xf32>
    %3 = arith.subf %0, %2 : vector<2x512xf32>
    %c0_3 = arith.constant 0 : index
    %c0_4 = arith.constant 0 : index
    %4 = vector.load %arg4[%c0_3, %c0_4] : memref<1x512xf32, #tpu.memory_space<vmem>>, vector<1x512xf32>
    %cst = arith.constant 9.99999974E-6 : f32
    %5 = vector.broadcast %cst : f32 to vector<1x512xf32>
    %6 = arith.addf %4, %5 : vector<1x512xf32>
    %7 = math.rsqrt %6 : vector<1x512xf32>
    %8 = vector.broadcast %7 : vector<1x512xf32> to vector<2x512xf32>
    %9 = arith.mulf %3, %8 : vector<2x512xf32>
    %c0_5 = arith.constant 0 : index
    %c0_6 = arith.constant 0 : index
    %10 = vector.load %arg1[%c0_5, %c0_6] : memref<1x512xf32, #tpu.memory_space<vmem>>, vector<1x512xf32>
    %11 = vector.broadcast %10 : vector<1x512xf32> to vector<2x512xf32>
    %12 = arith.mulf %9, %11 : vector<2x512xf32>
    %c0_7 = arith.constant 0 : index
    %c0_8 = arith.constant 0 : index
    %13 = vector.load %arg2[%c0_7, %c0_8] : memref<1x512xf32, #tpu.memory_space<vmem>>, vector<1x512xf32>
    %14 = vector.broadcast %13 : vector<1x512xf32> to vector<2x512xf32>
    %15 = arith.addf %12, %14 : vector<2x512xf32>
    %16 = arith.truncf %15 : vector<2x512xf32> to vector<2x512xbf16>
    %c0_9 = arith.constant 0 : index
    %c0_10 = arith.constant 0 : index
    %17 = vector.load %arg5[%c0_9, %c0_10] : memref<512x1024xbf16, #tpu.memory_space<vmem>>, vector<512x1024xbf16>
    %cst_11 = arith.constant dense<0.000000e+00> : vector<2x1024xf32>
    %18 = tpu.matmul %16, %17, %cst_11 {dimension_numbers = #tpu.dot_dimension_numbers<[1], [0], [0], [1], [0, 0, 1, 1], [], []>} : vector<2x512xbf16>, vector<512x1024xbf16>, vector<2x1024xf32> -> vector<2x1024xf32>
    %c0_12 = arith.constant 0 : index
    %c0_13 = arith.constant 0 : index
    %19 = vector.load %arg6[%c0_12, %c0_13] : memref<1x1024xf32, #tpu.memory_space<vmem>>, vector<1x1024xf32>
    %20 = vector.broadcast %19 : vector<1x1024xf32> to vector<2x1024xf32>
    %21 = arith.addf %18, %20 : vector<2x1024xf32>
    %22 = math.tanh %21 : vector<2x1024xf32>
    %23 = arith.truncf %22 : vector<2x1024xf32> to vector<2x1024xbf16>
    %c0_14 = arith.constant 0 : index
    %c0_15 = arith.constant 0 : index
    %24 = vector.load %arg7[%c0_14, %c0_15] : memref<1024x128xbf16, #tpu.memory_space<vmem>>, vector<1024x128xbf16>
    %cst_16 = arith.constant dense<0.000000e+00> : vector<2x128xf32>
    %25 = tpu.matmul %23, %24, %cst_16 {dimension_numbers = #tpu.dot_dimension_numbers<[1], [0], [0], [1], [0, 0, 1, 1], [], []>} : vector<2x1024xbf16>, vector<1024x128xbf16>, vector<2x128xf32> -> vector<2x128xf32>
    %c0_17 = arith.constant 0 : index
    %c0_18 = arith.constant 0 : index
    %26 = vector.load %arg8[%c0_17, %c0_18] : memref<1x128xf32, #tpu.memory_space<vmem>>, vector<1x128xf32>
    %27 = vector.broadcast %26 : vector<1x128xf32> to vector<2x128xf32>
    %28 = arith.addf %25, %27 : vector<2x128xf32>
    %c0_19 = arith.constant 0 : index
    %c0_20 = arith.constant 0 : index
    %29 = vector.load %arg11[%c0_19, %c0_20] : memref<1x128xf32, #tpu.memory_space<vmem>>, vector<1x128xf32>
    %30 = vector.broadcast %29 : vector<1x128xf32> to vector<2x128xf32>
    %31 = arith.subf %28, %30 : vector<2x128xf32>
    %c0_21 = arith.constant 0 : index
    %c0_22 = arith.constant 0 : index
    %32 = vector.load %arg12[%c0_21, %c0_22] : memref<1x128xf32, #tpu.memory_space<vmem>>, vector<1x128xf32>
    %cst_23 = arith.constant 9.99999974E-6 : f32
    %33 = vector.broadcast %cst_23 : f32 to vector<1x128xf32>
    %34 = arith.addf %32, %33 : vector<1x128xf32>
    %35 = math.rsqrt %34 : vector<1x128xf32>
    %36 = vector.broadcast %35 : vector<1x128xf32> to vector<2x128xf32>
    %37 = arith.mulf %31, %36 : vector<2x128xf32>
    %c0_24 = arith.constant 0 : index
    %c0_25 = arith.constant 0 : index
    %38 = vector.load %arg9[%c0_24, %c0_25] : memref<1x128xf32, #tpu.memory_space<vmem>>, vector<1x128xf32>
    %39 = vector.broadcast %38 : vector<1x128xf32> to vector<2x128xf32>
    %40 = arith.mulf %37, %39 : vector<2x128xf32>
    %c0_26 = arith.constant 0 : index
    %c0_27 = arith.constant 0 : index
    %41 = vector.load %arg10[%c0_26, %c0_27] : memref<1x128xf32, #tpu.memory_space<vmem>>, vector<1x128xf32>
    %42 = vector.broadcast %41 : vector<1x128xf32> to vector<2x128xf32>
    %43 = arith.addf %40, %42 : vector<2x128xf32>
    %44 = math.tanh %43 : vector<2x128xf32>
    %45 = arith.mulf %44, %44 : vector<2x128xf32>
    %cst_28 = arith.constant dense<0.000000e+00> : vector<2xf32>
    %46 = vector.multi_reduction <add>, %45, %cst_28 [1] : vector<2x128xf32> to vector<2xf32>
    %47 = vector.shape_cast %46 : vector<2xf32> to vector<2x1xf32>
    %cst_29 = arith.constant 1.000000e-24 : f32
    %48 = vector.broadcast %cst_29 : f32 to vector<2x1xf32>
    %49 = arith.maximumf %47, %48 : vector<2x1xf32>
    %50 = math.rsqrt %49 : vector<2x1xf32>
    %51 = vector.broadcast %50 : vector<2x1xf32> to vector<2x128xf32>
    %52 = arith.mulf %44, %51 : vector<2x128xf32>
    %c0_30 = arith.constant 0 : index
    %c0_31 = arith.constant 0 : index
    %53 = vector.load %arg13[%c0_30, %c0_31] : memref<2x128xf32, #tpu.memory_space<vmem>>, vector<2x128xf32>
    tpu.vector_store %arg13[%c0_30, %c0_31], %52 {strides = array<i32>} : memref<2x128xf32, #tpu.memory_space<vmem>>, vector<2x128xf32>,
    return
  }
}

</mosaic_0001>

<bundles_post_ra>
// kernel: food_space_image_encoder.2
= control target key start
LH: loop header
LB: loop body
LE: loop exit
PB: predicated region body
PF: predicated region fallthrough
CT: control target
= control target key end

     0   :  { %s1384_s12 = smov 0   ;;  %s1386_s13 = smov 0   ;;  %s1651_s0 = inlined_call_operand.vmem [shape: bf16[2,16,16,32], index: 0, kind: input, shape index: {}]   ;;  %s1652_s1 = inlined_call_operand.vmem [shape: bf16[32,512], index: 1, kind: input, shape index: {}]   ;;  %s1653_s2 = inlined_call_operand.vmem [shape: f32[1,512], index: 2, kind: input, shape index: {}]   ;;  %s1654_s3 = inlined_call_operand.vmem [shape: f32[2,512], index: 3, kind: output, shape index: {}]  }
   0x1   :  { %s1388_s14 = smov 0   ;;  %s1390_s15 = smov 0  }
   0x2   :  { %s1392_s16 = smov 0   ;;  %s1394_s17 = smov 0  }
   0x3   :  { %s1396_s18 = smov 0   ;;  %s1398_s19 = smov 0  }
   0x4   :  { %s1400_s20 = smov 0  }
   0x5 LB: > { %s22_s21 = sadd.s32 1, %s1351_s18  ;;  %s25_s22 = sadd.s32 1, %s1355_s19  ;;  %s1359_s20 = sphi %s1400_s20, %s13_s20   ;;  %s1355_s19 = sphi %s1398_s19, %s1663_s19   ;;  %s1351_s18 = sphi %s1396_s18, %s1662_s18   ;;  %s1347_s17 = sphi %s1394_s17, %s1661_s17   ;;  %s1343_s16 = sphi %s1392_s16, %s1660_s16   ;;  %s1339_s15 = sphi %s1390_s15, %s1659_s15   ;;  %s1335_s14 = sphi %s1388_s14, %s1658_s14   ;;  %s1331_s13 = sphi %s1386_s13, %s1657_s13   ;;  %s1327_s12 = sphi %s1384_s12, %s1656_s12  }
   0x6   : > { %p23_p0 = scmp.ge.s32.totalorder %s22_s21, 2  ;;  %s32_s23 = sadd.s32 1, %s1339_s15 }
   0x7   : > { %p39_p1 = scmp.ne.s32.totalorder %s1339_s15, %s1335_s14  ;;  %p40_p2 = scmp.eq.s32.totalorder %s1359_s20, 0 }
   0x8   : > { %s1665_s21 = smov (%p23_p0, %s22_s21), 0  ;;  %s1667_s22 = smov (!%p23_p0, %s25_s22), %s1355_s19 }
   0x9   : > { %s29_s24 = ssub.s32 %s1351_s18, %s1665_s21  ;;  %p41_p3 = por %p40_p2, %p39_p1 }
   0xa   : > { %p27_p4 = scmp.ge.s32.totalorder %s1667_s22, 2  ;;  %p30_p5 = scmp.eq.s32.totalorder %s29_s24, 0 }
   0xb   : > { %s58_s25 = sadd.s32 1, %s1331_s13  ;;  %p65_p6 = scmp.ne.s32.totalorder %s1331_s13, %s1327_s12 }
   0xc   : > { %s1669_s22 = smov (%p27_p4, %s1667_s22), 0  ;;  %p1131_p9 = scmp.ge.s32.totalorder %s1359_s20, 4 }
   0xd   : > { %s1446_s26 = scalar_select %p30_p5, %s1339_s15, %s32_s23  }
   0xe   : > { %s55_s27 = ssub.s32 %s1355_s19, %s1669_s22  ;;  %p1450_p7 = por %p65_p6, %p40_p2 }
   0xf   : > { %p56_p8 = scmp.eq.s32.totalorder %s55_s27, 0  ;;  %143 = sbr.rel (%p1131_p9) target bundleno = 41 (0x29), region = 16 }
  0x11   : > { %s1455_s29 = scalar_select %p56_p8, %s1331_s13, %s58_s25  }
  0x16   : > { %146 = sbr.rel (!%p41_p3) target bundleno = 34 (0x22), region = 20  ;;  %s148_s30 = sand.u32 (%p41_p3), 1, %s1339_s15  }
  0x17   : > { %s1186_s4 = sshll.u32 (%p41_p3), %s1351_s18, 6  ;;  %s1132_s5 = sshll.u32 (%p41_p3), %s148_s30, 7 }
  0x18   : > { %s1463_s8 = scalar_lea.vmem (%p41_p3), %s1651_s0, %s1186_s4  ;;  %s150_s9 = scalar_lea.vmem (%p41_p3), [#allocation2], %s1132_s5 }
  0x19   : > { %v170_v0 = vld [vmem:[%s1463_s8] sm:$0xff] (%p41_p3)   ;;  %v174_v1 = vld [vmem:[%s1463_s8 + $0x8] sm:$0xff] (%p41_p3)   ;;  %v178_v2 = vld [vmem:[%s1463_s8 + $0x10] sm:$0xff] (%p41_p3)  }
  0x1a   : > { %171 = vst [vmem:[%s150_s9] sm:$0xff] (%p41_p3), %v170_v0   ;;  %175 = vst [vmem:[%s150_s9 + $0x8] sm:$0xff] (%p41_p3), %v174_v1   ;;  %v182_v3 = vld [vmem:[%s1463_s8 + $0x18] sm:$0xff] (%p41_p3)   ;;  %v186_v4 = vld [vmem:[%s1463_s8 + $0x20] sm:$0xff] (%p41_p3)  }
  0x1b   : > { %179 = vst [vmem:[%s150_s9 + $0x10] sm:$0xff] (%p41_p3), %v178_v2   ;;  %v190_v5 = vld [vmem:[%s1463_s8 + $0x28] sm:$0xff] (%p41_p3)   ;;  %183 = vst [vmem:[%s150_s9 + $0x18] sm:$0xff] (%p41_p3), %v182_v3   ;;  %v194_v6 = vld [vmem:[%s1463_s8 + $0x30] sm:$0xff] (%p41_p3)  }
  0x1c   : > { %187 = vst [vmem:[%s150_s9 + $0x20] sm:$0xff] (%p41_p3), %v186_v4   ;;  %191 = vst [vmem:[%s150_s9 + $0x28] sm:$0xff] (%p41_p3), %v190_v5   ;;  %v198_v7 = vld [vmem:[%s1463_s8 + $0x38] sm:$0xff] (%p41_p3)   ;;  %v202_v8 = vld [vmem:[%s1463_s8 + $0x80] sm:$0xff] (%p41_p3)  }
  0x1d   : > { %195 = vst [vmem:[%s150_s9 + $0x30] sm:$0xff] %v194_v6   ;;  %199 = vst [vmem:[%s150_s9 + $0x38] sm:$0xff] %v198_v7   ;;  %v206_v9 = vld [vmem:[%s1463_s8 + $0x88] sm:$0xff]   ;;  %v210_v10 = vld [vmem:[%s1463_s8 + $0x90] sm:$0xff]  }
  0x1e   : > { %203 = vst [vmem:[%s150_s9 + $0x40] sm:$0xff] %v202_v8   ;;  %v214_v11 = vld [vmem:[%s1463_s8 + $0x98] sm:$0xff]   ;;  %207 = vst [vmem:[%s150_s9 + $0x48] sm:$0xff] %v206_v9   ;;  %v218_v12 = vld [vmem:[%s1463_s8 + $0xa0] sm:$0xff]  }
  0x1f   : > { %211 = vst [vmem:[%s150_s9 + $0x50] sm:$0xff] %v210_v10   ;;  %215 = vst [vmem:[%s150_s9 + $0x58] sm:$0xff] %v214_v11   ;;  %v222_v13 = vld [vmem:[%s1463_s8 + $0xa8] sm:$0xff]   ;;  %v226_v14 = vld [vmem:[%s1463_s8 + $0xb0] sm:$0xff]  }
  0x20   : > { %219 = vst [vmem:[%s150_s9 + $0x60] sm:$0xff] %v218_v12   ;;  %223 = vst [vmem:[%s150_s9 + $0x68] sm:$0xff] %v222_v13   ;;  %v230_v15 = vld [vmem:[%s1463_s8 + $0xb8] sm:$0xff]  }
  0x21   : > { %227 = vst [vmem:[%s150_s9 + $0x70] sm:$0xff] %v226_v14   ;;  %231 = vst [vmem:[%s150_s9 + $0x78] sm:$0xff] %v230_v15  }
  0x22 PF: > { %320 = sbr.rel (!%p1450_p7) target bundleno = 41 (0x29), region = 61  ;;  %s322_s10 = sand.u32 (%p1450_p7), 1, %s1331_s13  }
  0x23   : > { %s1187_s11 = sshll.u32 (%p1450_p7), %s1355_s19, 3  ;;  %s1136_s23 = sshll.u32 (%p1450_p7), %s322_s10, 5 }
  0x24   : > { %s327_s27 = scalar_lea.vmem (%p1450_p7), %s1652_s1, %s1187_s11  ;;  %s324_s30 = scalar_lea.vmem (%p1450_p7), [#allocation3], %s1136_s23 }
  0x25   : > { %v361_v16 = vld [vmem:[%s327_s27] sm:$0xff] (%p1450_p7)  ;;  %v363_v17 = vld [vmem:[%s327_s27 + $0x10] sm:$0xff] (%p1450_p7) }
  0x26   : > { %v365_v18 = vld [vmem:[%s327_s27 + $0x20] sm:$0xff] (%p1450_p7)  ;;  %362 = vst [vmem:[%s324_s30] sm:$0xff] (%p1450_p7), %v361_v16  ;;  %364 = vst [vmem:[%s324_s30 + $0x8] sm:$0xff] (%p1450_p7), %v363_v17  ;;  %v367_v19 = vld [vmem:[%s327_s27 + $0x30] sm:$0xff] (%p1450_p7) }
  0x27   : > { %366 = vst [vmem:[%s324_s30 + $0x10] sm:$0xff] (%p1450_p7), %v365_v18  ;;  %368 = vst [vmem:[%s324_s30 + $0x18] sm:$0xff] (%p1450_p7), %v367_v19 }
  0x29 PF: > { %p1139_p10 = scmp.ge.s32.totalorder %s1359_s20, 1  ;;  %p381_p11 = scmp.lt.s32.totalorder %s1359_s20, 5 }
  0x2b   : > { %p382_p12 = pnand %p1139_p10, %p381_p11 }
  0x2c   : > { %s388_s28 = sand.u32 (!%p382_p12), 1, %s1335_s14   ;;  %s395_s4 = sand.u32 (!%p382_p12), 1, %s1327_s12  }
  0x2d   : > { %385 = sbr.rel (%p382_p12) target bundleno = 381 (0x17d), region = 103  ;;  %s1140_s5 = sshll.u32 (!%p382_p12), %s388_s28, 7 }
  0x2e   : > { %s1141_s6 = sshll.u32 (!%p382_p12), %s395_s4, 5  ;;  %s1142_s7 = sshll.u32 (!%p382_p12), %s1347_s17, 1 }
  0x2f   : > { %p429_p13 = scmp.lt.s32.totalorder (!%p382_p12), %s1142_s7, 3  ;;  %s1505_s14 = scalar_lea.vmem (!%p382_p12), [#allocation2], %s1140_s5 }
  0x30   : > { %s397_s12 = scalar_lea.vmem (!%p382_p12), [#allocation3], %s1141_s6  ;;  %p1145_p0 = scmp.ne.s32.totalorder (!%p382_p12), %s1343_s16, 0 }
  0x34   : > { %s1671_s7 = smov (!%p429_p13, %s1142_s7), 3  ;;  %443 = sbr.rel (%p1145_p0) target bundleno = 59 (0x3b), region = 115 }
  0x35   : > { %s431_s10 = scalar_lea.vmem %s1653_s2, %s1671_s7  ;;  %s1144_s11 = sshll.u32 %s1671_s7, 1  ;;  %v1361_v20 = vmov (!%p1145_p0), 0.0  }
  0x36   : > { %s1503_s25 = scalar_lea.vmem %s1654_s3, %s1144_s11 }
  0x37   : > { %444 = vst [vmem:[%s1503_s25] sm:$0xf] (!%p1145_p0), %v1361_v20 }
  0x3b PF: > { %v1267_v21 = vld [vmem:[%s397_s12 + $0x4] ss:$8 sps:$4 sm:$0xff]   ;;  %v1269_v22 = vld [vmem:[%s397_s12] ss:$8 sps:$4 sm:$0xff]   ;;  %v1362_v23 = vmov 0   ;;  %vm593_vm0 = vcmask 261120   ;;  %v483_v42 = vlaneseq }
  0x3c   : > { %674 = vmatprep.mubr.bf16.mxu0 %v1362_v23  ;;  %754 = vmatprep.mubr.bf16.mxu1 %v1362_v23  ;;  %v1270_v24 = vld [vmem:[%s397_s12 + $0x14] ss:$8 sps:$4 sm:$0xff]   ;;  %v1272_v25 = vld [vmem:[%s397_s12 + $0x10] ss:$8 sps:$4 sm:$0xff]   ;;  %v1273_v26 = vld [vmem:[%s1505_s14] sm:$0xff]   ;;  %vm1009_vm1 = vcmask 1041409  }
  0x3d   : > { %642 = vmatprep.subr.bf16.mxu0 %v1267_v21  ;;  %1188 = vmatprep.subr.bf16.mxu1 %v1267_v21  ;;  %v1274_v27 = vld [vmem:[%s1505_s14 + $0x40] sm:$0xff]   ;;  %v1275_v28 = vld [vmem:[%s1505_s14 + $0x8] sm:$0xff]   ;;  %v1277_v30 = vld [vmem:[%s1505_s14 + $0x10] sm:$0xff]   ;;  %v1541_v43 = vshrl.u32 %v483_v42, 7  ;;  %vm1011_vm2 = vcmask 1043459   ;;  %vm1013_vm3 = vcmask 1045509  }
  0x3e   : > { %643 = vmatpush1.bf16.msra.mxu0 %v1269_v22  ;;  %1190 = vmatpush1.bf16.msra.mxu1 %v1269_v22  ;;  %v1276_v29 = vld [vmem:[%s1505_s14 + $0x48] sm:$0xff]   ;;  %v1278_v31 = vld [vmem:[%s1505_s14 + $0x50] sm:$0xff]   ;;  %v1279_v32 = vld [vmem:[%s1505_s14 + $0x18] sm:$0xff]   ;;  %vm1015_vm4 = vcmask 1047559   ;;  %p1182_p1 = scmp.ne.s32.totalorder %s1343_s16, 1 }
  0x3f   : > { %644 = vmatprep.subr.bf16.mxu0 %v1270_v24  ;;  %1189 = vmatprep.subr.bf16.mxu1 %v1270_v24  ;;  %v1280_v33 = vld [vmem:[%s1505_s14 + $0x58] sm:$0xff]   ;;  %v1281_v34 = vld [vmem:[%s1505_s14 + $0x20] sm:$0xff]   ;;  %v1283_v36 = vld [vmem:[%s1505_s14 + $0x28] sm:$0xff]   ;;  %v485_v44 = vsub.s32 0, %v1541_v43  ;;  %v489_v46 = vsub.s32 1, %v1541_v43 }
  0x40   : > { %v1282_v35 = vld [vmem:[%s1505_s14 + $0x60] sm:$0xff]   ;;  %v1284_v37 = vld [vmem:[%s1505_s14 + $0x68] sm:$0xff]   ;;  %v1285_v38 = vld [vmem:[%s1505_s14 + $0x30] sm:$0xff]  }
  0x41   : > { %v1286_v39 = vld [vmem:[%s1505_s14 + $0x70] sm:$0xff]   ;;  %v1287_v40 = vld [vmem:[%s1505_s14 + $0x38] sm:$0xff]   ;;  %v481_v45 = vld [vmem:[%s431_s10] sm:$0x3] }
  0x42   : > { %645 = vmatpush1.bf16.msra.mxu0 %v1272_v25  ;;  %1191 = vmatpush1.bf16.msra.mxu1 %v1272_v25  ;;  %v1288_v41 = vld [vmem:[%s1505_s14 + $0x78] sm:$0xff]   ;;  %v1550_v47 = vrot.slane %v481_v45, %v485_v44  ;;  %v1552_v48 = vrot.slane %v481_v45, %v489_v46 }
  0x45   : > { %1166 = vmatmul.mubr.msk.bf16.vlgmr.msra.gmra.mrb[0].mxu0 %vm593_vm0, %v1273_v26  ;;  %1174 = vmatmul.mubr.msk.bf16.vlgmr.msra.gmra.mrb[0].mxu1 %vm593_vm0, %v1274_v27 }
  0x46   : > { %684 = vmatprep.mubr.bf16.mxu0 %v1362_v23  ;;  %764 = vmatprep.mubr.bf16.mxu1 %v1362_v23 }
  0x4d   : > { %1167 = vmatmul.mubr.msk.bf16.gmra.mrb[4].mxu0 %vm593_vm0, %v1275_v28  ;;  %1175 = vmatmul.mubr.msk.bf16.gmra.mrb[4].mxu1 %vm593_vm0, %v1276_v29 }
  0x4e   : > { %694 = vmatprep.mubr.bf16.mxu0 %v1362_v23  ;;  %774 = vmatprep.mubr.bf16.mxu1 %v1362_v23 }
  0x55   : > { %1168 = vmatmul.mubr.msk.bf16.gmra.mrb[8].mxu0 %vm593_vm0, %v1277_v30  ;;  %1176 = vmatmul.mubr.msk.bf16.gmra.mrb[8].mxu1 %vm593_vm0, %v1278_v31 }
  0x56   : > { %704 = vmatprep.mubr.bf16.mxu0 %v1362_v23  ;;  %784 = vmatprep.mubr.bf16.mxu1 %v1362_v23 }
  0x5d   : > { %1169 = vmatmul.mubr.msk.bf16.gmra.mrb[12].mxu0 %vm593_vm0, %v1279_v32  ;;  %1177 = vmatmul.mubr.msk.bf16.gmra.mrb[12].mxu1 %vm593_vm0, %v1280_v33 }
  0x5e   : > { %714 = vmatprep.mubr.bf16.mxu0 %v1362_v23  ;;  %794 = vmatprep.mubr.bf16.mxu1 %v1362_v23 }
  0x65   : > { %1170 = vmatmul.mubr.msk.bf16.gmra.mrb[16].mxu0 %vm593_vm0, %v1281_v34  ;;  %1178 = vmatmul.mubr.msk.bf16.gmra.mrb[16].mxu1 %vm593_vm0, %v1282_v35 }
  0x66   : > { %724 = vmatprep.mubr.bf16.mxu0 %v1362_v23  ;;  %804 = vmatprep.mubr.bf16.mxu1 %v1362_v23 }
  0x6d   : > { %1171 = vmatmul.mubr.msk.bf16.gmra.mrb[20].mxu0 %vm593_vm0, %v1283_v36  ;;  %1179 = vmatmul.mubr.msk.bf16.gmra.mrb[20].mxu1 %vm593_vm0, %v1284_v37 }
  0x6e   : > { %734 = vmatprep.mubr.bf16.mxu0 %v1362_v23  ;;  %814 = vmatprep.mubr.bf16.mxu1 %v1362_v23 }
  0x75   : > { %1172 = vmatmul.mubr.msk.bf16.gmra.mrb[24].mxu0 %vm593_vm0, %v1285_v38  ;;  %1180 = vmatmul.mubr.msk.bf16.gmra.mrb[24].mxu1 %vm593_vm0, %v1286_v39 }
  0x76   : > { %744 = vmatprep.mubr.bf16.mxu0 %v1362_v23  ;;  %824 = vmatprep.mubr.bf16.mxu1 %v1362_v23 }
  0x7d   : > { %1173 = vmatmul.mubr.msk.bf16.gmra.mrb[28].mxu0 %vm593_vm0, %v1287_v40  ;;  %1181 = vmatmul.mubr.msk.bf16.gmra.mrb[28].mxu1 %vm593_vm0, %v1288_v41 }
 0x118   : > { %v676_v49 = vpop.f32.mrb[0].mxu0  ;;  %v756_v50 = vpop.f32.mrb[0].mxu1 }
 0x119   : > { %v677_v51 = vadd.f32 %v676_v49, %v1550_v47  ;;  %v757_v52 = vadd.f32 %v756_v50, %v1550_v47  ;;  %v678_v53 = vpop.f32.mrb[1].mxu0  ;;  %v758_v54 = vpop.f32.mrb[1].mxu1 }
 0x11a   : > { %v679_v55 = vadd.f32 %v678_v53, %v1552_v48  ;;  %v759_v56 = vadd.f32 %v758_v54, %v1552_v48  ;;  %v680_v57 = vpop.f32.mrb[2].mxu0  ;;  %v760_v58 = vpop.f32.mrb[2].mxu1 }
 0x11b   : > { %v835_v59 = vmax.f32 %v677_v51, 0.0  ;;  %v681_v60 = vadd.f32 %v680_v57, %v1550_v47  ;;  %v761_v61 = vadd.f32 %v760_v58, %v1550_v47  ;;  %v682_v62 = vpop.f32.mrb[3].mxu0  ;;  %v762_v63 = vpop.f32.mrb[3].mxu1  ;;  %v867_v3 = vmax.f32 %v757_v52, 0.0 }
 0x11c   : > { %v836_v0 = vmax.f32 %v679_v55, 0.0  ;;  %v683_v1 = vadd.f32 %v682_v62, %v1552_v48  ;;  %v763_v2 = vadd.f32 %v762_v63, %v1552_v48  ;;  %v868_v6 = vmax.f32 %v759_v56, 0.0 }
 0x11d   : > { %v837_v4 = vmax.f32 %v681_v60, 0.0  ;;  %v869_v5 = vmax.f32 %v761_v61, 0.0 }
 0x11e   : > { %v838_v7 = vmax.f32 %v683_v1, 0.0  ;;  %v870_v8 = vmax.f32 %v763_v2, 0.0 }
 0x11f   : > { %v900_v9 = vadd.f32 %v837_v4, %v835_v59  ;;  %v942_v10 = vadd.f32 %v869_v5, %v867_v3 }
 0x120   : > { %v921_v11 = vadd.f32 %v838_v7, %v836_v0  ;;  %v963_v12 = vadd.f32 %v870_v8, %v868_v6  ;;  %v686_v13 = vpop.f32.mrb[4].mxu0  ;;  %v766_v14 = vpop.f32.mrb[4].mxu1 }
 0x121   : > { %v687_v15 = vadd.f32 %v686_v13, %v1550_v47  ;;  %v767_v16 = vadd.f32 %v766_v14, %v1550_v47  ;;  %v688_v17 = vpop.f32.mrb[5].mxu0  ;;  %v768_v18 = vpop.f32.mrb[5].mxu1 }
 0x122   : > { %v689_v19 = vadd.f32 %v688_v17, %v1552_v48  ;;  %v769_v20 = vadd.f32 %v768_v18, %v1552_v48  ;;  %v690_v21 = vpop.f32.mrb[6].mxu0  ;;  %v770_v22 = vpop.f32.mrb[6].mxu1 }
 0x123   : > { %v839_v23 = vmax.f32 %v687_v15, 0.0  ;;  %v871_v24 = vmax.f32 %v767_v16, 0.0  ;;  %v691_v25 = vadd.f32 %v690_v21, %v1550_v47  ;;  %v771_v26 = vadd.f32 %v770_v22, %v1550_v47  ;;  %v692_v27 = vpop.f32.mrb[7].mxu0  ;;  %v772_v28 = vpop.f32.mrb[7].mxu1 }
 0x124   : > { %v840_v29 = vmax.f32 %v689_v19, 0.0  ;;  %v872_v30 = vmax.f32 %v769_v20, 0.0  ;;  %v693_v31 = vadd.f32 %v692_v27, %v1552_v48  ;;  %v773_v32 = vadd.f32 %v772_v28, %v1552_v48 }
 0x125   : > { %v901_v33 = vadd.f32 %v900_v9, %v839_v23  ;;  %v943_v34 = vadd.f32 %v942_v10, %v871_v24  ;;  %v841_v35 = vmax.f32 %v691_v25, 0.0  ;;  %v873_v36 = vmax.f32 %v771_v26, 0.0 }
 0x126   : > { %v922_v37 = vadd.f32 %v921_v11, %v840_v29  ;;  %v964_v38 = vadd.f32 %v963_v12, %v872_v30  ;;  %v842_v39 = vmax.f32 %v693_v31, 0.0  ;;  %v874_v40 = vmax.f32 %v773_v32, 0.0 }
 0x127   : > { %v902_v41 = vadd.f32 %v901_v33, %v841_v35  ;;  %v944_v42 = vadd.f32 %v943_v34, %v873_v36 }
 0x128   : > { %v923_v44 = vadd.f32 %v922_v37, %v842_v39  ;;  %v965_v45 = vadd.f32 %v964_v38, %v874_v40  ;;  %v696_v46 = vpop.f32.mrb[8].mxu0  ;;  %v776_v49 = vpop.f32.mrb[8].mxu1 }
 0x129   : > { %v697_v50 = vadd.f32 %v696_v46, %v1550_v47  ;;  %v777_v51 = vadd.f32 %v776_v49, %v1550_v47  ;;  %v698_v52 = vpop.f32.mrb[9].mxu0  ;;  %v778_v53 = vpop.f32.mrb[9].mxu1 }
 0x12a   : > { %v699_v54 = vadd.f32 %v698_v52, %v1552_v48  ;;  %v779_v55 = vadd.f32 %v778_v53, %v1552_v48  ;;  %v700_v56 = vpop.f32.mrb[10].mxu0  ;;  %v780_v57 = vpop.f32.mrb[10].mxu1 }
 0x12b   : > { %v843_v58 = vmax.f32 %v697_v50, 0.0  ;;  %v875_v59 = vmax.f32 %v777_v51, 0.0  ;;  %v701_v60 = vadd.f32 %v700_v56, %v1550_v47  ;;  %v781_v61 = vadd.f32 %v780_v57, %v1550_v47  ;;  %v702_v62 = vpop.f32.mrb[11].mxu0  ;;  %v782_v63 = vpop.f32.mrb[11].mxu1 }
 0x12c   : > { %v844_v0 = vmax.f32 %v699_v54, 0.0  ;;  %v876_v1 = vmax.f32 %v779_v55, 0.0  ;;  %v703_v2 = vadd.f32 %v702_v62, %v1552_v48  ;;  %v783_v3 = vadd.f32 %v782_v63, %v1552_v48 }
 0x12d   : > { %v903_v4 = vadd.f32 %v902_v41, %v843_v58  ;;  %v945_v5 = vadd.f32 %v944_v42, %v875_v59  ;;  %v845_v6 = vmax.f32 %v701_v60, 0.0  ;;  %v877_v7 = vmax.f32 %v781_v61, 0.0 }
 0x12e   : > { %v924_v8 = vadd.f32 %v923_v44, %v844_v0  ;;  %v966_v9 = vadd.f32 %v965_v45, %v876_v1  ;;  %v846_v10 = vmax.f32 %v703_v2, 0.0  ;;  %v878_v11 = vmax.f32 %v783_v3, 0.0 }
 0x12f   : > { %v904_v12 = vadd.f32 %v903_v4, %v845_v6  ;;  %v946_v13 = vadd.f32 %v945_v5, %v877_v7 }
 0x130   : > { %v925_v14 = vadd.f32 %v924_v8, %v846_v10  ;;  %v967_v15 = vadd.f32 %v966_v9, %v878_v11  ;;  %v706_v16 = vpop.f32.mrb[12].mxu0  ;;  %v786_v17 = vpop.f32.mrb[12].mxu1 }
 0x131   : > { %v707_v18 = vadd.f32 %v706_v16, %v1550_v47  ;;  %v787_v19 = vadd.f32 %v786_v17, %v1550_v47  ;;  %v708_v20 = vpop.f32.mrb[13].mxu0  ;;  %v788_v21 = vpop.f32.mrb[13].mxu1 }
 0x132   : > { %v709_v22 = vadd.f32 %v708_v20, %v1552_v48  ;;  %v789_v23 = vadd.f32 %v788_v21, %v1552_v48  ;;  %v710_v24 = vpop.f32.mrb[14].mxu0  ;;  %v790_v25 = vpop.f32.mrb[14].mxu1 }
 0x133   : > { %v847_v26 = vmax.f32 %v707_v18, 0.0  ;;  %v879_v27 = vmax.f32 %v787_v19, 0.0  ;;  %v711_v28 = vadd.f32 %v710_v24, %v1550_v47  ;;  %v791_v29 = vadd.f32 %v790_v25, %v1550_v47  ;;  %v712_v30 = vpop.f32.mrb[15].mxu0  ;;  %v792_v31 = vpop.f32.mrb[15].mxu1 }
 0x134   : > { %v848_v32 = vmax.f32 %v709_v22, 0.0  ;;  %v880_v33 = vmax.f32 %v789_v23, 0.0  ;;  %v713_v34 = vadd.f32 %v712_v30, %v1552_v48  ;;  %v793_v35 = vadd.f32 %v792_v31, %v1552_v48 }
 0x135   : > { %v905_v36 = vadd.f32 %v904_v12, %v847_v26  ;;  %v947_v37 = vadd.f32 %v946_v13, %v879_v27  ;;  %v849_v38 = vmax.f32 %v711_v28, 0.0  ;;  %v881_v39 = vmax.f32 %v791_v29, 0.0 }
 0x136   : > { %v926_v40 = vadd.f32 %v925_v14, %v848_v32  ;;  %v968_v41 = vadd.f32 %v967_v15, %v880_v33  ;;  %v850_v42 = vmax.f32 %v713_v34, 0.0  ;;  %v882_v44 = vmax.f32 %v793_v35, 0.0 }
 0x137   : > { %v906_v45 = vadd.f32 %v905_v36, %v849_v38  ;;  %v948_v46 = vadd.f32 %v947_v37, %v881_v39 }
 0x138   : > { %v927_v49 = vadd.f32 %v926_v40, %v850_v42  ;;  %v969_v50 = vadd.f32 %v968_v41, %v882_v44  ;;  %v716_v51 = vpop.f32.mrb[16].mxu0  ;;  %v796_v52 = vpop.f32.mrb[16].mxu1 }
 0x139   : > { %v717_v53 = vadd.f32 %v716_v51, %v1550_v47  ;;  %v797_v54 = vadd.f32 %v796_v52, %v1550_v47  ;;  %v718_v55 = vpop.f32.mrb[17].mxu0  ;;  %v798_v56 = vpop.f32.mrb[17].mxu1 }
 0x13a   : > { %v719_v57 = vadd.f32 %v718_v55, %v1552_v48  ;;  %v799_v58 = vadd.f32 %v798_v56, %v1552_v48  ;;  %v720_v59 = vpop.f32.mrb[18].mxu0  ;;  %v800_v60 = vpop.f32.mrb[18].mxu1 }
 0x13b   : > { %v851_v61 = vmax.f32 %v717_v53, 0.0  ;;  %v883_v62 = vmax.f32 %v797_v54, 0.0  ;;  %v721_v63 = vadd.f32 %v720_v59, %v1550_v47  ;;  %v801_v0 = vadd.f32 %v800_v60, %v1550_v47  ;;  %v722_v1 = vpop.f32.mrb[19].mxu0  ;;  %v802_v2 = vpop.f32.mrb[19].mxu1 }
 0x13c   : > { %v852_v3 = vmax.f32 %v719_v57, 0.0  ;;  %v884_v4 = vmax.f32 %v799_v58, 0.0  ;;  %v723_v5 = vadd.f32 %v722_v1, %v1552_v48  ;;  %v803_v6 = vadd.f32 %v802_v2, %v1552_v48 }
 0x13d   : > { %v907_v7 = vadd.f32 %v906_v45, %v851_v61  ;;  %v949_v8 = vadd.f32 %v948_v46, %v883_v62  ;;  %v853_v9 = vmax.f32 %v721_v63, 0.0  ;;  %v885_v10 = vmax.f32 %v801_v0, 0.0 }
 0x13e   : > { %v928_v11 = vadd.f32 %v927_v49, %v852_v3  ;;  %v970_v12 = vadd.f32 %v969_v50, %v884_v4  ;;  %v854_v13 = vmax.f32 %v723_v5, 0.0  ;;  %v886_v14 = vmax.f32 %v803_v6, 0.0 }
 0x13f   : > { %v908_v15 = vadd.f32 %v907_v7, %v853_v9  ;;  %v950_v16 = vadd.f32 %v949_v8, %v885_v10 }
 0x140   : > { %v929_v17 = vadd.f32 %v928_v11, %v854_v13  ;;  %v971_v18 = vadd.f32 %v970_v12, %v886_v14  ;;  %v726_v19 = vpop.f32.mrb[20].mxu0  ;;  %v806_v20 = vpop.f32.mrb[20].mxu1 }
 0x141   : > { %v727_v21 = vadd.f32 %v726_v19, %v1550_v47  ;;  %v807_v22 = vadd.f32 %v806_v20, %v1550_v47  ;;  %v728_v23 = vpop.f32.mrb[21].mxu0  ;;  %v808_v24 = vpop.f32.mrb[21].mxu1 }
 0x142   : > { %v729_v25 = vadd.f32 %v728_v23, %v1552_v48  ;;  %v809_v26 = vadd.f32 %v808_v24, %v1552_v48  ;;  %v730_v27 = vpop.f32.mrb[22].mxu0  ;;  %v810_v28 = vpop.f32.mrb[22].mxu1 }
 0x143   : > { %v855_v29 = vmax.f32 %v727_v21, 0.0  ;;  %v887_v30 = vmax.f32 %v807_v22, 0.0  ;;  %v731_v31 = vadd.f32 %v730_v27, %v1550_v47  ;;  %v811_v32 = vadd.f32 %v810_v28, %v1550_v47  ;;  %v732_v33 = vpop.f32.mrb[23].mxu0  ;;  %v812_v34 = vpop.f32.mrb[23].mxu1 }
 0x144   : > { %v856_v35 = vmax.f32 %v729_v25, 0.0  ;;  %v888_v36 = vmax.f32 %v809_v26, 0.0  ;;  %v733_v37 = vadd.f32 %v732_v33, %v1552_v48  ;;  %v813_v38 = vadd.f32 %v812_v34, %v1552_v48 }
 0x145   : > { %v909_v39 = vadd.f32 %v908_v15, %v855_v29  ;;  %v951_v40 = vadd.f32 %v950_v16, %v887_v30  ;;  %v857_v41 = vmax.f32 %v731_v31, 0.0  ;;  %v889_v42 = vmax.f32 %v811_v32, 0.0 }
 0x146   : > { %v930_v44 = vadd.f32 %v929_v17, %v856_v35  ;;  %v972_v45 = vadd.f32 %v971_v18, %v888_v36  ;;  %v858_v46 = vmax.f32 %v733_v37, 0.0  ;;  %v890_v49 = vmax.f32 %v813_v38, 0.0 }
 0x147   : > { %v910_v50 = vadd.f32 %v909_v39, %v857_v41  ;;  %v952_v51 = vadd.f32 %v951_v40, %v889_v42 }
 0x148   : > { %v931_v52 = vadd.f32 %v930_v44, %v858_v46  ;;  %v973_v53 = vadd.f32 %v972_v45, %v890_v49  ;;  %v736_v54 = vpop.f32.mrb[24].mxu0  ;;  %v816_v55 = vpop.f32.mrb[24].mxu1 }
 0x149   : > { %v737_v56 = vadd.f32 %v736_v54, %v1550_v47  ;;  %v817_v57 = vadd.f32 %v816_v55, %v1550_v47  ;;  %v738_v58 = vpop.f32.mrb[25].mxu0  ;;  %v818_v59 = vpop.f32.mrb[25].mxu1 }
 0x14a   : > { %v739_v60 = vadd.f32 %v738_v58, %v1552_v48  ;;  %v819_v61 = vadd.f32 %v818_v59, %v1552_v48  ;;  %v740_v62 = vpop.f32.mrb[26].mxu0  ;;  %v820_v63 = vpop.f32.mrb[26].mxu1 }
 0x14b   : > { %v859_v0 = vmax.f32 %v737_v56, 0.0  ;;  %v891_v1 = vmax.f32 %v817_v57, 0.0  ;;  %v741_v2 = vadd.f32 %v740_v62, %v1550_v47  ;;  %v821_v3 = vadd.f32 %v820_v63, %v1550_v47  ;;  %v742_v4 = vpop.f32.mrb[27].mxu0  ;;  %v822_v5 = vpop.f32.mrb[27].mxu1 }
 0x14c   : > { %v860_v6 = vmax.f32 %v739_v60, 0.0  ;;  %v892_v7 = vmax.f32 %v819_v61, 0.0  ;;  %v743_v8 = vadd.f32 %v742_v4, %v1552_v48  ;;  %v823_v9 = vadd.f32 %v822_v5, %v1552_v48 }
 0x14d   : > { %v911_v10 = vadd.f32 %v910_v50, %v859_v0  ;;  %v953_v11 = vadd.f32 %v952_v51, %v891_v1  ;;  %v861_v12 = vmax.f32 %v741_v2, 0.0  ;;  %v893_v13 = vmax.f32 %v821_v3, 0.0 }
 0x14e   : > { %v932_v14 = vadd.f32 %v931_v52, %v860_v6  ;;  %v974_v15 = vadd.f32 %v973_v53, %v892_v7  ;;  %v862_v16 = vmax.f32 %v743_v8, 0.0  ;;  %v894_v17 = vmax.f32 %v823_v9, 0.0 }
 0x14f   : > { %v912_v18 = vadd.f32 %v911_v10, %v861_v12  ;;  %v954_v19 = vadd.f32 %v953_v11, %v893_v13 }
 0x150   : > { %v933_v20 = vadd.f32 %v932_v14, %v862_v16  ;;  %v975_v21 = vadd.f32 %v974_v15, %v894_v17  ;;  %v746_v22 = vpop.f32.mrb[28].mxu0  ;;  %v826_v23 = vpop.f32.mrb[28].mxu1 }
 0x151   : > { %v747_v24 = vadd.f32 %v746_v22, %v1550_v47  ;;  %v827_v25 = vadd.f32 %v826_v23, %v1550_v47  ;;  %v748_v26 = vpop.f32.mrb[29].mxu0  ;;  %v828_v27 = vpop.f32.mrb[29].mxu1 }
 0x152   : > { %v749_v28 = vadd.f32 %v748_v26, %v1552_v48  ;;  %v829_v29 = vadd.f32 %v828_v27, %v1552_v48  ;;  %v750_v30 = vpop.f32.mrb[30].mxu0  ;;  %v830_v31 = vpop.f32.mrb[30].mxu1 }
 0x153   : > { %v863_v32 = vmax.f32 %v747_v24, 0.0  ;;  %v895_v33 = vmax.f32 %v827_v25, 0.0  ;;  %v751_v34 = vadd.f32 %v750_v30, %v1550_v47  ;;  %v831_v35 = vadd.f32 %v830_v31, %v1550_v47  ;;  %v752_v36 = vpop.f32.mrb[31].mxu0  ;;  %v832_v37 = vpop.f32.mrb[31].mxu1  ;;  %v899_v25 = vld [vmem:[%s1503_s25] sm:$0xf] }
 0x154   : > { %v864_v38 = vmax.f32 %v749_v28, 0.0  ;;  %v896_v39 = vmax.f32 %v829_v29, 0.0  ;;  %v753_v40 = vadd.f32 %v752_v36, %v1552_v48  ;;  %v833_v41 = vadd.f32 %v832_v37, %v1552_v48 }
 0x155   : > { %v913_v42 = vadd.f32 %v912_v18, %v863_v32  ;;  %v955_v44 = vadd.f32 %v954_v19, %v895_v33  ;;  %v865_v45 = vmax.f32 %v751_v34, 0.0  ;;  %v897_v46 = vmax.f32 %v831_v35, 0.0 }
 0x156   : > { %v934_v49 = vadd.f32 %v933_v20, %v864_v38  ;;  %v976_v50 = vadd.f32 %v975_v21, %v896_v39  ;;  %v866_v51 = vmax.f32 %v753_v40, 0.0  ;;  %v898_v52 = vmax.f32 %v833_v41, 0.0 }
 0x157   : > { %v914_v53 = vadd.f32 %v913_v42, %v865_v45  ;;  %v956_v54 = vadd.f32 %v955_v44, %v897_v46  ;;  %v1363_v48 = vmov 1983009808  }
 0x158   : > { %v935_v55 = vadd.f32 %v934_v49, %v866_v51  ;;  %v977_v47 = vadd.f32 %v976_v50, %v898_v52  ;;  %v990_v63 = vunpack.c.l.s4 %v1363_v48 }
 0x159   : > { %v915_v56 = vrot.slane %v914_v53, 4  ;;  %v957_v57 = vrot.slane %v956_v54, 4 }
 0x15a   : > { %v936_v58 = vrot.slane %v935_v55, 4  ;;  %v978_v59 = vrot.slane %v977_v47, 4  ;;  %v991_v8 = vunpack.c.0.s8 %v990_v63 }
 0x15b   : > { %v916_v60 = vadd.f32 %v915_v56, %v914_v53  ;;  %v958_v61 = vadd.f32 %v957_v57, %v956_v54 }
 0x15c   : > { %v937_v62 = vadd.f32 %v936_v58, %v935_v55  ;;  %v979_v0 = vadd.f32 %v978_v59, %v977_v47  ;;  %v994_v17 = vsub.s32 %v991_v8, %v1541_v43 }
 0x15d   : > { %v917_v1 = vrot.slane %v916_v60, 2  ;;  %v959_v2 = vrot.slane %v958_v61, 2 }
 0x15e   : > { %v938_v3 = vrot.slane %v937_v62, 2  ;;  %v980_v4 = vrot.slane %v979_v0, 2 }
 0x15f   : > { %v918_v5 = vadd.f32 %v917_v1, %v916_v60  ;;  %v960_v6 = vadd.f32 %v959_v2, %v958_v61 }
 0x160   : > { %v939_v7 = vadd.f32 %v938_v3, %v937_v62  ;;  %v981_v9 = vadd.f32 %v980_v4, %v979_v0 }
 0x161   : > { %v919_v10 = vrot.slane %v918_v5, 1  ;;  %v961_v11 = vrot.slane %v960_v6, 1 }
 0x162   : > { %v940_v12 = vrot.slane %v939_v7, 1  ;;  %v982_v13 = vrot.slane %v981_v9, 1 }
 0x163   : > { %v920_v14 = vadd.f32 %v919_v10, %v918_v5  ;;  %v962_v15 = vadd.f32 %v961_v11, %v960_v6 }
 0x164   : > { %v941_v16 = vadd.f32 %v940_v12, %v939_v7  ;;  %v983_v18 = vadd.f32 %v982_v13, %v981_v9 }
 0x166   : > { %v988_v19 = vcombine.low %v920_v14, %v941_v16  ;;  %v996_v20 = vcombine.low %v962_v15, %v983_v18 }
 0x168   : > { %v1003_v21 = vrot.slane %v996_v20, %v994_v17  ;;  %v995_v22 = vrot.slane %v988_v19, %v994_v17 }
 0x16a   : > { %v1008_v23 = vrot.slane %v1003_v21, 7 }
 0x16c   : > { %v1010_v24 = vsel %vm1009_vm1, %v1008_v23, %v995_v22  ;;  %1023 = sbr.rel (%p1182_p1) target bundleno = 381 (0x17d), region = 119 }
 0x16d   : > { %v1012_v26 = vsel %vm1011_vm2, %v1008_v23, %v1010_v24 }
 0x16e   : > { %v1014_v27 = vsel %vm1013_vm3, %v1008_v23, %v1012_v26 }
 0x16f   : > { %v1016_v28 = vsel %vm1015_vm4, %v1008_v23, %v1014_v27 }
 0x170   : > { %v1018_v29 = vadd.f32 %v1016_v28, %v899_v25 }
 0x172   : > { %1019 = vst [vmem:[%s1503_s25] sm:$0xf] %v1018_v29 }
 0x179   : > { %v1024_v43 = vld [vmem:[%s1503_s25] sm:$0xf] }
 0x17a   : > { %v1025_v30 = vmul.f32 0.00390625, %v1024_v43 }
 0x17c   : > { %1026 = vst [vmem:[%s1503_s25] sm:$0xf] %v1025_v30 }
 0x17d PF: > { %s13_s20 = sadd.s32 1, %s1359_s20   ;;  %s1656_s12 = smov %s1331_s13 }
 0x17e   : > { %p10_p2 = scmp.ge.s32.totalorder %s13_s20, 6   ;;  %s1657_s13 = smov %s1455_s29 }
 0x17f   : > { %s1658_s14 = smov %s1339_s15  ;;  %s1659_s15 = smov %s1446_s26 }
 0x180   : > { %s1660_s16 = smov %s1351_s18  ;;  %s1661_s17 = smov %s1355_s19 }
 0x181   : > { %s1662_s18 = smov %s1665_s21  ;;  %s1663_s19 = smov %s1669_s22 }
 0x182   :  { %12 = sbr.rel (!%p10_p2) target bundleno = 5 (0x5), region = 165 }

// kernel: food_space_image_encoder.3
= control target key start
LH: loop header
LB: loop body
LE: loop exit
PB: predicated region body
PF: predicated region fallthrough
CT: control target
= control target key end

     0   :  { %v49_v32 = vlaneseq  ;;  %v3432_v51 = vmov 1983009808   ;;  %s4601_s0 = inlined_call_operand.vmem [shape: f32[2,512], index: 0, kind: input, shape index: {}]   ;;  %s4602_s1 = inlined_call_operand.vmem [shape: f32[1,512], index: 1, kind: input, shape index: {}]   ;;  %s4603_s2 = inlined_call_operand.vmem [shape: f32[1,512], index: 2, kind: input, shape index: {}]   ;;  %s4604_s3 = inlined_call_operand.vmem [shape: f32[1,512], index: 3, kind: input, shape index: {}]   ;;  %s4605_s4 = inlined_call_operand.vmem [shape: f32[1,512], index: 4, kind: input, shape index: {}]   ;;  %s4606_s5 = inlined_call_operand.vmem [shape: bf16[512,1024], index: 5, kind: input, shape index: {}]   ;;  %s4607_s6 = inlined_call_operand.vmem [shape: f32[1,1024], index: 6, kind: input, shape index: {}]   ;;  %s4608_s7 = inlined_call_operand.vmem [shape: bf16[1024,128], index: 7, kind: input, shape index: {}]   ;;  %s4609_s8 = inlined_call_operand.vmem [shape: f32[1,128], index: 8, kind: input, shape index: {}]   ;;  %s4610_s9 = inlined_call_operand.vmem [shape: f32[1,128], index: 9, kind: input, shape index: {}]   ;;  %s4611_s10 = inlined_call_operand.vmem [shape: f32[1,128], index: 10, kind: input, shape index: {}]   ;;  %s4612_s11 = inlined_call_operand.vmem [shape: f32[1,128], index: 11, kind: input, shape index: {}]   ;;  %s4613_s12 = inlined_call_operand.vmem [shape: f32[1,128], index: 12, kind: input, shape index: {}]   ;;  %s4614_s13 = inlined_call_operand.hbm [shape: f32[2,128], index: 13, kind: output, shape index: {}]  }
   0x1   :  { %v223_v0 = vld [vmem:[%s4606_s5] sm:$0xff]  ;;  %v224_v2 = vld [vmem:[%s4606_s5 + $0x8] sm:$0xff]  ;;  %v68_v52 = vunpack.c.l.s4 %v3432_v51 }
   0x2   :  { %v227_v1 = vld [vmem:[%s4606_s5 + $0x20] sm:$0xff]  ;;  %v228_v4 = vld [vmem:[%s4606_s5 + $0x28] sm:$0xff]  ;;  %v3570_v41 = vshrl.u32 %v49_v32, 7 }
   0x3   :  { %v2883_v3 = vcombine.high %v223_v0, %v227_v1  ;;  %v2882_v5 = vcombine.low %v223_v0, %v227_v1  ;;  %v231_v6 = vld [vmem:[%s4606_s5 + $0x40] sm:$0xff]  ;;  %v2885_v8 = vcombine.high %v224_v2, %v228_v4  ;;  %v2884_v9 = vcombine.low %v224_v2, %v228_v4  ;;  %v232_v11 = vld [vmem:[%s4606_s5 + $0x48] sm:$0xff] }
   0x4   :  { %v235_v7 = vld [vmem:[%s4606_s5 + $0x60] sm:$0xff]  ;;  %v236_v12 = vld [vmem:[%s4606_s5 + $0x68] sm:$0xff]  ;;  %v3585_v50 = vsub.s32 0, %v3570_v41  ;;  %v3594_v55 = vsub.s32 1, %v3570_v41  ;;  %v3597_v56 = vsub.s32 2, %v3570_v41  ;;  %v3600_v57 = vsub.s32 3, %v3570_v41 }
   0x5   :  { %v2891_v10 = vcombine.high %v231_v6, %v235_v7  ;;  %v239_v13 = vld [vmem:[%s4606_s5 + $0x80] sm:$0xff]  ;;  %1801 = vmatprep.subr.bf16.mxu0 %v2883_v3  ;;  %v2893_v14 = vcombine.high %v232_v11, %v236_v12  ;;  %v240_v16 = vld [vmem:[%s4606_s5 + $0x88] sm:$0xff]  ;;  %1883 = vmatprep.subr.bf16.mxu1 %v2885_v8  ;;  %v2890_v18 = vcombine.low %v231_v6, %v235_v7  ;;  %v69_v2 = vunpack.c.0.s8 %v68_v52 }
   0x6   :  { %v243_v15 = vld [vmem:[%s4606_s5 + $0xa0] sm:$0xff]  ;;  %v244_v17 = vld [vmem:[%s4606_s5 + $0xa8] sm:$0xff]  ;;  %1802 = vmatpush1.bf16.msra.mxu0 %v2882_v5  ;;  %1884 = vmatpush1.bf16.msra.mxu1 %v2884_v9  ;;  %v2892_v19 = vcombine.low %v232_v11, %v236_v12 }
   0x7   :  { %1803 = vmatprep.subr.bf16.mxu0 %v2891_v10  ;;  %v2899_v20 = vcombine.high %v239_v13, %v243_v15  ;;  %1885 = vmatprep.subr.bf16.mxu1 %v2893_v14  ;;  %v2901_v21 = vcombine.high %v240_v16, %v244_v17  ;;  %v247_v22 = vld [vmem:[%s4606_s5 + $0xc0] sm:$0xff]  ;;  %v248_v24 = vld [vmem:[%s4606_s5 + $0xc8] sm:$0xff]  ;;  %v2898_v26 = vcombine.low %v239_v13, %v243_v15 }
   0x8   :  { %v251_v23 = vld [vmem:[%s4606_s5 + $0xe0] sm:$0xff]  ;;  %v252_v25 = vld [vmem:[%s4606_s5 + $0xe8] sm:$0xff]  ;;  %v2900_v27 = vcombine.low %v240_v16, %v244_v17 }
   0x9   :  { %v2907_v28 = vcombine.high %v247_v22, %v251_v23  ;;  %v2909_v29 = vcombine.high %v248_v24, %v252_v25  ;;  %v255_v30 = vld [vmem:[%s4606_s5 + $0x100] sm:$0xff]  ;;  %v256_v33 = vld [vmem:[%s4606_s5 + $0x108] sm:$0xff]  ;;  %v2906_v35 = vcombine.low %v247_v22, %v251_v23  ;;  %v2908_v36 = vcombine.low %v248_v24, %v252_v25 }
   0xa   :  { %1804 = vmatpush1.bf16.msra.mxu0 %v2890_v18  ;;  %1886 = vmatpush1.bf16.msra.mxu1 %v2892_v19  ;;  %v259_v31 = vld [vmem:[%s4606_s5 + $0x120] sm:$0xff]  ;;  %v260_v34 = vld [vmem:[%s4606_s5 + $0x128] sm:$0xff] }
   0xb   :  { %1805 = vmatprep.subr.bf16.mxu0 %v2899_v20  ;;  %1887 = vmatprep.subr.bf16.mxu1 %v2901_v21  ;;  %v2915_v37 = vcombine.high %v255_v30, %v259_v31  ;;  %v2917_v38 = vcombine.high %v256_v33, %v260_v34  ;;  %v263_v39 = vld [vmem:[%s4606_s5 + $0x140] sm:$0xff]  ;;  %v264_v42 = vld [vmem:[%s4606_s5 + $0x148] sm:$0xff]  ;;  %v2914_v44 = vcombine.low %v255_v30, %v259_v31 }
   0xc   :  { %v267_v40 = vld [vmem:[%s4606_s5 + $0x160] sm:$0xff]  ;;  %v268_v43 = vld [vmem:[%s4606_s5 + $0x168] sm:$0xff]  ;;  %v2916_v45 = vcombine.low %v256_v33, %v260_v34  ;;  %v3640_v21 = vsub.s32 %v69_v2, %v3570_v41 }
   0xd   :  { %v2923_v46 = vcombine.high %v263_v39, %v267_v40  ;;  %v2925_v47 = vcombine.high %v264_v42, %v268_v43  ;;  %v271_v48 = vld [vmem:[%s4606_s5 + $0x180] sm:$0xff]  ;;  %v272_v53 = vld [vmem:[%s4606_s5 + $0x188] sm:$0xff]  ;;  %v2922_v58 = vcombine.low %v263_v39, %v267_v40  ;;  %v2924_v59 = vcombine.low %v264_v42, %v268_v43 }
   0xe   :  { %1806 = vmatpush1.bf16.msra.mxu0 %v2898_v26  ;;  %1888 = vmatpush1.bf16.msra.mxu1 %v2900_v27  ;;  %v275_v49 = vld [vmem:[%s4606_s5 + $0x1a0] sm:$0xff]  ;;  %v276_v54 = vld [vmem:[%s4606_s5 + $0x1a8] sm:$0xff] }
   0xf   :  { %1807 = vmatprep.subr.bf16.mxu0 %v2907_v28  ;;  %1889 = vmatprep.subr.bf16.mxu1 %v2909_v29  ;;  %v2931_v60 = vcombine.high %v271_v48, %v275_v49  ;;  %v47_v61 = vld [vmem:[%s4604_s3] sm:$0xf]  ;;  %v2933_v62 = vcombine.high %v272_v53, %v276_v54  ;;  %v280_v4 = vld [vmem:[%s4606_s5 + $0x1c8] sm:$0xff]  ;;  %v2930_v10 = vcombine.low %v271_v48, %v275_v49 }
  0x10   :  { %v279_v63 = vld [vmem:[%s4606_s5 + $0x1c0] sm:$0xff]  ;;  %v52_v1 = vrot.slane %v47_v61, %v3585_v50  ;;  %v284_v5 = vld [vmem:[%s4606_s5 + $0x1e8] sm:$0xff]  ;;  %v56_v6 = vrot.slane %v47_v61, %v3594_v55  ;;  %v60_v7 = vrot.slane %v47_v61, %v3597_v56  ;;  %v64_v8 = vrot.slane %v47_v61, %v3600_v57 }
  0x11   :  { %v283_v0 = vld [vmem:[%s4606_s5 + $0x1e0] sm:$0xff]  ;;  %v2932_v11 = vcombine.low %v272_v53, %v276_v54  ;;  %v2941_v15 = vcombine.high %v280_v4, %v284_v5  ;;  %v288_v16 = vld [vmem:[%s4606_s5 + $0x208] sm:$0xff]  ;;  %v2940_v24 = vcombine.low %v280_v4, %v284_v5 }
  0x12   :  { %1808 = vmatpush1.bf16.msra.mxu0 %v2906_v35  ;;  %1890 = vmatpush1.bf16.msra.mxu1 %v2908_v36  ;;  %v84_v3 = vld [vmem:[%s4605_s4] sm:$0xf]  ;;  %v2939_v12 = vcombine.high %v279_v63, %v283_v0  ;;  %v292_v17 = vld [vmem:[%s4606_s5 + $0x228] sm:$0xff]  ;;  %v65_v19 = vcombine.low %v52_v1, %v56_v6  ;;  %v66_v20 = vcombine.low %v60_v7, %v64_v8 }
  0x13   :  { %1809 = vmatprep.subr.bf16.mxu0 %v2915_v37  ;;  %1891 = vmatprep.subr.bf16.mxu1 %v2917_v38  ;;  %v85_v9 = vadd.f32 1e-05, %v84_v3  ;;  %v287_v13 = vld [vmem:[%s4606_s5 + $0x200] sm:$0xff]  ;;  %v2938_v23 = vcombine.low %v279_v63, %v283_v0  ;;  %v2949_v26 = vcombine.high %v288_v16, %v292_v17  ;;  %v296_v35 = vld [vmem:[%s4606_s5 + $0x248] sm:$0xff]  ;;  %v2948_v43 = vcombine.low %v288_v16, %v292_v17 }
  0x14   :  { %v291_v14 = vld [vmem:[%s4606_s5 + $0x220] sm:$0xff]  ;;  %v300_v36 = vld [vmem:[%s4606_s5 + $0x268] sm:$0xff]  ;;  %v73_v37 = vrot.slane %v65_v19, %v3640_v21  ;;  %v80_v38 = vrot.slane %v66_v20, %v3640_v21 }
  0x15   :  { %3384 = vrsqrt.f32 %v85_v9  ;;  %v123_v18 = vld [vmem:[%s4602_s1] sm:$0xf]  ;;  %v2947_v25 = vcombine.high %v287_v13, %v291_v14  ;;  %v2946_v42 = vcombine.low %v287_v13, %v291_v14  ;;  %v304_v48 = vld [vmem:[%s4606_s5 + $0x288] sm:$0xff]  ;;  %v2956_v1 = vcombine.low %v296_v35, %v300_v36 }
  0x16   :  { %1810 = vmatpush1.bf16.msra.mxu0 %v2914_v44  ;;  %1892 = vmatpush1.bf16.msra.mxu1 %v2916_v45  ;;  %v160_v22 = vld [vmem:[%s4603_s2] sm:$0xf]  ;;  %v128_v27 = vrot.slane %v123_v18, %v3585_v50  ;;  %v132_v28 = vrot.slane %v123_v18, %v3594_v55  ;;  %v136_v31 = vrot.slane %v123_v18, %v3597_v56  ;;  %v308_v49 = vld [vmem:[%s4606_s5 + $0x2a8] sm:$0xff] }
  0x17   :  { %1811 = vmatprep.subr.bf16.mxu0 %v2923_v46  ;;  %1893 = vmatprep.subr.bf16.mxu1 %v2925_v47  ;;  %v295_v29 = vld [vmem:[%s4606_s5 + $0x240] sm:$0xff]  ;;  %v140_v32 = vrot.slane %v123_v18, %v3600_v57  ;;  %v165_v33 = vrot.slane %v160_v22, %v3585_v50  ;;  %v169_v34 = vrot.slane %v160_v22, %v3594_v55  ;;  %v316_v13 = vld [vmem:[%s4606_s5 + $0x2e8] sm:$0xff] }
  0x18   :  { %v299_v30 = vld [vmem:[%s4606_s5 + $0x260] sm:$0xff]  ;;  %v173_v39 = vrot.slane %v160_v22, %v3597_v56  ;;  %v177_v40 = vrot.slane %v160_v22, %v3600_v57  ;;  %v2957_v46 = vcombine.high %v296_v35, %v300_v36  ;;  %v141_v51 = vcombine.low %v128_v27, %v132_v28  ;;  %v320_v27 = vld [vmem:[%s4606_s5 + $0x308] sm:$0xff] }
  0x19   :  { %v2955_v44 = vcombine.high %v295_v29, %v299_v30  ;;  %v303_v45 = vld [vmem:[%s4606_s5 + $0x280] sm:$0xff]  ;;  %v142_v52 = vcombine.low %v136_v31, %v140_v32  ;;  %v2954_v54 = vcombine.low %v295_v29, %v299_v30  ;;  %v2965_v3 = vcombine.high %v304_v48, %v308_v49  ;;  %v324_v28 = vld [vmem:[%s4606_s5 + $0x328] sm:$0xff] }
  0x1a   :  { %1812 = vmatpush1.bf16.msra.mxu0 %v2922_v58  ;;  %1894 = vmatpush1.bf16.msra.mxu1 %v2924_v59  ;;  %v307_v47 = vld [vmem:[%s4606_s5 + $0x2a0] sm:$0xff]  ;;  %v81_v58 = vcombine.low %v73_v37, %v80_v38  ;;  %v178_v59 = vcombine.low %v165_v33, %v169_v34  ;;  %v149_v9 = vrot.slane %v141_v51, %v3640_v21  ;;  %v328_v38 = vld [vmem:[%s4606_s5 + $0x348] sm:$0xff] }
  0x1b   :  { %1813 = vmatprep.subr.bf16.mxu0 %v2931_v60  ;;  %1895 = vmatprep.subr.bf16.mxu1 %v2933_v62  ;;  %v179_v60 = vcombine.low %v173_v39, %v177_v40  ;;  %v2963_v2 = vcombine.high %v303_v45, %v307_v47  ;;  %v46_v4 = vld [vmem:[%s4601_s0] sm:$0xff]  ;;  %v2964_v19 = vcombine.low %v304_v48, %v308_v49  ;;  %v332_v39 = vld [vmem:[%s4606_s5 + $0x368] sm:$0xff] }
  0x1c   :  { %v311_v5 = vld [vmem:[%s4606_s5 + $0x2c0] sm:$0xff]  ;;  %v186_v14 = vrot.slane %v178_v59, %v3640_v21  ;;  %v2981_v34 = vcombine.high %v320_v27, %v324_v28  ;;  %v336_v49 = vld [vmem:[%s4606_s5 + $0x388] sm:$0xff] }
  0x1d   :  { %v315_v6 = vld [vmem:[%s4606_s5 + $0x2e0] sm:$0xff]  ;;  %v193_v18 = vrot.slane %v179_v60, %v3640_v21  ;;  %v340_v51 = vld [vmem:[%s4606_s5 + $0x3a8] sm:$0xff] }
  0x1e   :  { %1814 = vmatpush1.bf16.msra.mxu0 %v2930_v10  ;;  %1896 = vmatpush1.bf16.msra.mxu1 %v2932_v11  ;;  %v156_v10 = vrot.slane %v142_v52, %v3640_v21  ;;  %v2962_v11 = vcombine.low %v303_v45, %v307_v47  ;;  %v2971_v20 = vcombine.high %v311_v5, %v315_v6  ;;  %v327_v35 = vld [vmem:[%s4606_s5 + $0x340] sm:$0xff] }
  0x1f   :  { %1815 = vmatprep.subr.bf16.mxu0 %v2939_v12  ;;  %1897 = vmatprep.subr.bf16.mxu1 %v2941_v15  ;;  %v3385_v53 = vpop.eup %3384  ;;  %v312_v12 = vld [vmem:[%s4606_s5 + $0x2c8] sm:$0xff]  ;;  %v83_v15 = vsub.f32 %v46_v4, %v81_v58  ;;  %v2970_v29 = vcombine.low %v311_v5, %v315_v6  ;;  %v194_v31 = vcombine.low %v186_v14, %v193_v18  ;;  %v331_v36 = vld [vmem:[%s4606_s5 + $0x360] sm:$0xff] }
  0x20   :  { %v91_v61 = vrot.slane %v3385_v53, %v3585_v50  ;;  %v95_v62 = vrot.slane %v3385_v53, %v3594_v55  ;;  %v99_v63 = vrot.slane %v3385_v53, %v3597_v56  ;;  %v103_v0 = vrot.slane %v3385_v53, %v3600_v57  ;;  %v339_v47 = vld [vmem:[%s4606_s5 + $0x3a0] sm:$0xff]  ;;  %v360_v18 = vld [vmem:[%s4606_s5 + $0x448] sm:$0xff] }
  0x21   :  { %v2973_v22 = vcombine.high %v312_v12, %v316_v13  ;;  %v2972_v32 = vcombine.low %v312_v12, %v316_v13  ;;  %v2989_v45 = vcombine.high %v328_v38, %v332_v39  ;;  %v2986_v52 = vcombine.low %v327_v35, %v331_v36  ;;  %v343_v60 = vld [vmem:[%s4606_s5 + $0x3c0] sm:$0xff] }
  0x22   :  { %1816 = vmatpush1.bf16.msra.mxu0 %v2938_v23  ;;  %1898 = vmatpush1.bf16.msra.mxu1 %v2940_v24  ;;  %v104_v7 = vcombine.low %v91_v61, %v95_v62  ;;  %v105_v8 = vcombine.low %v99_v63, %v103_v0  ;;  %v319_v23 = vld [vmem:[%s4606_s5 + $0x300] sm:$0xff]  ;;  %v2997_v59 = vcombine.high %v336_v49, %v340_v51  ;;  %v344_v0 = vld [vmem:[%s4606_s5 + $0x3c8] sm:$0xff] }
  0x23   :  { %1817 = vmatprep.subr.bf16.mxu0 %v2947_v25  ;;  %1899 = vmatprep.subr.bf16.mxu1 %v2949_v26  ;;  %v323_v24 = vld [vmem:[%s4606_s5 + $0x320] sm:$0xff]  ;;  %v157_v26 = vcombine.low %v149_v9, %v156_v10  ;;  %v352_v9 = vld [vmem:[%s4606_s5 + $0x408] sm:$0xff] }
  0x24   :  { %v112_v16 = vrot.slane %v104_v7, %v3640_v21  ;;  %v119_v17 = vrot.slane %v105_v8, %v3640_v21  ;;  %v2979_v33 = vcombine.high %v319_v23, %v323_v24  ;;  %v2978_v40 = vcombine.low %v319_v23, %v323_v24  ;;  %v347_v61 = vld [vmem:[%s4606_s5 + $0x3e0] sm:$0xff]  ;;  %v356_v10 = vld [vmem:[%s4606_s5 + $0x428] sm:$0xff] }
  0x25   :  { %v3003_v4 = vcombine.high %v343_v60, %v347_v61  ;;  %v351_v6 = vld [vmem:[%s4606_s5 + $0x400] sm:$0xff]  ;;  %v3013_v14 = vcombine.high %v352_v9, %v356_v10 }
  0x26   :  { %1818 = vmatpush1.bf16.msra.mxu0 %v2946_v42  ;;  %1900 = vmatpush1.bf16.msra.mxu1 %v2948_v43  ;;  %v120_v25 = vcombine.low %v112_v16, %v119_v17  ;;  %v2980_v43 = vcombine.low %v320_v27, %v324_v28  ;;  %v355_v7 = vld [vmem:[%s4606_s5 + $0x420] sm:$0xff]  ;;  %v368_v27 = vld [vmem:[%s4606_s5 + $0x488] sm:$0xff] }
  0x27   :  { %1819 = vmatprep.subr.bf16.mxu0 %v2955_v44  ;;  %1901 = vmatprep.subr.bf16.mxu1 %v2957_v46  ;;  %v2987_v44 = vcombine.high %v327_v35, %v331_v36  ;;  %v335_v46 = vld [vmem:[%s4606_s5 + $0x380] sm:$0xff]  ;;  %v3011_v13 = vcombine.high %v351_v6, %v355_v7  ;;  %v372_v28 = vld [vmem:[%s4606_s5 + $0x4a8] sm:$0xff] }
  0x28   :  { %v122_v30 = vmul.f32 %v120_v25, %v83_v15  ;;  %v2995_v58 = vcombine.high %v335_v46, %v339_v47  ;;  %v363_v15 = vld [vmem:[%s4606_s5 + $0x460] sm:$0xff]  ;;  %v376_v35 = vld [vmem:[%s4606_s5 + $0x4c8] sm:$0xff]  ;;  %v3029_v36 = vcombine.high %v368_v27, %v372_v28 }
  0x29   :  { %v367_v24 = vld [vmem:[%s4606_s5 + $0x480] sm:$0xff] }
  0x2a   :  { %1820 = vmatpush1.bf16.msra.mxu0 %v2954_v54  ;;  %1902 = vmatpush1.bf16.msra.mxu1 %v2956_v1  ;;  %v159_v37 = vmul.f32 %v157_v26, %v122_v30  ;;  %v2988_v54 = vcombine.low %v328_v38, %v332_v39  ;;  %v348_v1 = vld [vmem:[%s4606_s5 + $0x3e8] sm:$0xff]  ;;  %v371_v26 = vld [vmem:[%s4606_s5 + $0x4a0] sm:$0xff]  ;;  %v3028_v39 = vcombine.low %v368_v27, %v372_v28 }
  0x2b   :  { %1821 = vmatprep.subr.bf16.mxu0 %v2963_v2  ;;  %1903 = vmatprep.subr.bf16.mxu1 %v2965_v3  ;;  %v2994_v2 = vcombine.low %v335_v46, %v339_v47  ;;  %v2996_v3 = vcombine.low %v336_v49, %v340_v51  ;;  %v3005_v5 = vcombine.high %v344_v0, %v348_v1  ;;  %v388_v46 = vld [vmem:[%s4606_s5 + $0x528] sm:$0xff]  ;;  %v391_v51 = vld [vmem:[%s4606_s5 + $0x540] sm:$0xff] }
  0x2c   :  { %v196_v42 = vadd.f32 %v194_v31, %v159_v37  ;;  %v3004_v12 = vcombine.low %v344_v0, %v348_v1  ;;  %v380_v37 = vld [vmem:[%s4606_s5 + $0x4e8] sm:$0xff]  ;;  %v3026_v38 = vcombine.low %v367_v24, %v371_v26  ;;  %v403_v0 = vld [vmem:[%s4606_s5 + $0x5a0] sm:$0xff] }
  0x2d   :  { %v400_v1 = vld [vmem:[%s4606_s5 + $0x588] sm:$0xff] }
  0x2e   :  { %1822 = vmatpush1.bf16.msra.mxu0 %v2962_v11  ;;  %1904 = vmatpush1.bf16.msra.mxu1 %v2964_v19  ;;  %v205_v48 = vrot.slane %v196_v42, %v3640_v21  ;;  %v198_v63 = vcombine.high %v196_v42, %v196_v42  ;;  %v3002_v11 = vcombine.low %v343_v60, %v347_v61  ;;  %v364_v19 = vld [vmem:[%s4606_s5 + $0x468] sm:$0xff]  ;;  %v383_v42 = vld [vmem:[%s4606_s5 + $0x500] sm:$0xff] }
  0x2f   :  { %1823 = vmatprep.subr.bf16.mxu0 %v2971_v20  ;;  %1905 = vmatprep.subr.bf16.mxu1 %v2973_v22  ;;  %v3010_v20 = vcombine.low %v351_v6, %v355_v7  ;;  %v3012_v22 = vcombine.low %v352_v9, %v356_v10  ;;  %v3021_v25 = vcombine.high %v360_v18, %v364_v19  ;;  %v407_v7 = vld [vmem:[%s4606_s5 + $0x5c0] sm:$0xff]  ;;  %v408_v10 = vld [vmem:[%s4606_s5 + $0x5c8] sm:$0xff] }
  0x30   :  { %v213_v53 = vcombine.high %v205_v48, %v205_v48  ;;  %v3764_v8 = vrot.slane %v198_v63, %v3640_v21  ;;  %v359_v21 = vld [vmem:[%s4606_s5 + $0x440] sm:$0xff]  ;;  %v3780_v17 = vpack.c.bf16 %v205_v48, %v205_v48  ;;  %v3020_v31 = vcombine.low %v360_v18, %v364_v19  ;;  %v416_v18 = vld [vmem:[%s4606_s5 + $0x608] sm:$0xff] }
  0x31   :  { %v3019_v23 = vcombine.high %v359_v21, %v363_v15  ;;  %v3018_v30 = vcombine.low %v359_v21, %v363_v15  ;;  %v3036_v48 = vcombine.low %v376_v35, %v380_v37  ;;  %v399_v63 = vld [vmem:[%s4606_s5 + $0x580] sm:$0xff]  ;;  %v424_v27 = vld [vmem:[%s4606_s5 + $0x648] sm:$0xff] }
  0x32   :  { %1824 = vmatpush1.bf16.msra.mxu0 %v2970_v29  ;;  %1906 = vmatpush1.bf16.msra.mxu1 %v2972_v32  ;;  %v3747_v62 = vpack.c.bf16 %v213_v53, %v213_v53  ;;  %v214_v16 = vcombine.high %v3764_v8, %v3764_v8  ;;  %v3027_v32 = vcombine.high %v367_v24, %v371_v26  ;;  %v392_v53 = vld [vmem:[%s4606_s5 + $0x548] sm:$0xff]  ;;  %v411_v9 = vld [vmem:[%s4606_s5 + $0x5e0] sm:$0xff] }
  0x33   :  { %1825 = vmatprep.subr.bf16.mxu0 %v2979_v33  ;;  %1907 = vmatprep.subr.bf16.mxu1 %v2981_v34  ;;  %v375_v33 = vld [vmem:[%s4606_s5 + $0x4c0] sm:$0xff]  ;;  %v3059_v6 = vcombine.high %v399_v63, %v403_v0  ;;  %v3067_v21 = vcombine.high %v407_v7, %v411_v9 }
  0x34   :  { %1833 = vmatprep.mubr.bf16.mxu0 %v3747_v62  ;;  %1915 = vmatprep.mubr.bf16.mxu1 %v3747_v62  ;;  %v3800_v29 = vpack.c.bf16 %v214_v16, %v214_v16  ;;  %v379_v34 = vld [vmem:[%s4606_s5 + $0x4e0] sm:$0xff] }
  0x35   :  { %v3034_v47 = vcombine.low %v375_v33, %v379_v34  ;;  %v415_v15 = vld [vmem:[%s4606_s5 + $0x600] sm:$0xff] }
  0x36   :  { %1826 = vmatpush1.bf16.msra.mxu0 %v2978_v40  ;;  %1908 = vmatpush1.bf16.msra.mxu1 %v2980_v43  ;;  %v3035_v40 = vcombine.high %v375_v33, %v379_v34  ;;  %v387_v43 = vld [vmem:[%s4606_s5 + $0x520] sm:$0xff] }
  0x37   :  { %1827 = vmatprep.subr.bf16.mxu0 %v2987_v44  ;;  %1909 = vmatprep.subr.bf16.mxu1 %v2989_v45  ;;  %v384_v44 = vld [vmem:[%s4606_s5 + $0x508] sm:$0xff]  ;;  %v3037_v45 = vcombine.high %v376_v35, %v380_v37  ;;  %v3043_v49 = vcombine.high %v383_v42, %v387_v43  ;;  %v419_v16 = vld [vmem:[%s4606_s5 + $0x620] sm:$0xff] }
  0x38   :  { %v3044_v60 = vcombine.low %v384_v44, %v388_v46  ;;  %v3075_v24 = vcombine.high %v415_v15, %v419_v16  ;;  %v427_v26 = vld [vmem:[%s4606_s5 + $0x660] sm:$0xff] }
  0x39   :  { %v431_v34 = vld [vmem:[%s4606_s5 + $0x680] sm:$0xff] }
  0x3a   :  { %1828 = vmatpush1.bf16.msra.mxu0 %v2986_v52  ;;  %1910 = vmatpush1.bf16.msra.mxu1 %v2988_v54  ;;  %v395_v52 = vld [vmem:[%s4606_s5 + $0x560] sm:$0xff]  ;;  %v3045_v54 = vcombine.high %v384_v44, %v388_v46 }
  0x3b   :  { %1829 = vmatprep.subr.bf16.mxu0 %v2995_v58  ;;  %1911 = vmatprep.subr.bf16.mxu1 %v2997_v59  ;;  %v396_v58 = vld [vmem:[%s4606_s5 + $0x568] sm:$0xff]  ;;  %v3042_v59 = vcombine.low %v383_v42, %v387_v43  ;;  %v3051_v61 = vcombine.high %v391_v51, %v395_v52  ;;  %v435_v35 = vld [vmem:[%s4606_s5 + $0x6a0] sm:$0xff] }
  0x3c   :  { %v3091_v42 = vcombine.high %v431_v34, %v435_v35  ;;  %v439_v43 = vld [vmem:[%s4606_s5 + $0x6c0] sm:$0xff] }
  0x3d   :  { %v443_v44 = vld [vmem:[%s4606_s5 + $0x6e0] sm:$0xff] }
  0x3e   :  { %1830 = vmatpush1.bf16.msra.mxu0 %v2994_v2  ;;  %1912 = vmatpush1.bf16.msra.mxu1 %v2996_v3  ;;  %v3053_v2 = vcombine.high %v392_v53, %v396_v58  ;;  %v404_v3 = vld [vmem:[%s4606_s5 + $0x5a8] sm:$0xff] }
  0x3f   :  { %1831 = vmatprep.subr.bf16.mxu0 %v3003_v4  ;;  %1913 = vmatprep.subr.bf16.mxu1 %v3005_v5  ;;  %v3050_v4 = vcombine.low %v391_v51, %v395_v52  ;;  %v3052_v5 = vcombine.low %v392_v53, %v396_v58  ;;  %v3099_v51 = vcombine.high %v439_v43, %v443_v44  ;;  %v447_v52 = vld [vmem:[%s4606_s5 + $0x700] sm:$0xff] }
  0x40   :  { %v451_v53 = vld [vmem:[%s4606_s5 + $0x720] sm:$0xff] }
  0x42   :  { %1832 = vmatpush1.bf16.msra.mxu0 %v3002_v11  ;;  %1914 = vmatpush1.bf16.msra.mxu1 %v3004_v12  ;;  %v3061_v11 = vcombine.high %v400_v1, %v404_v3  ;;  %v412_v12 = vld [vmem:[%s4606_s5 + $0x5e8] sm:$0xff] }
  0x43   :  { %1842 = vmatprep.subr.bf16.mxu0 %v3011_v13  ;;  %1924 = vmatprep.subr.bf16.mxu1 %v3013_v14  ;;  %v3058_v13 = vcombine.low %v399_v63, %v403_v0  ;;  %v3060_v14 = vcombine.low %v400_v1, %v404_v3  ;;  %v3069_v19 = vcombine.high %v408_v10, %v412_v12  ;;  %v455_v0 = vld [vmem:[%s4606_s5 + $0x740] sm:$0xff] }
  0x44   :  { %v3107_v63 = vcombine.high %v447_v52, %v451_v53  ;;  %v459_v1 = vld [vmem:[%s4606_s5 + $0x760] sm:$0xff] }
  0x45   :  { %1834 = vmatmul.mubr.bf16.vlgmr.msra.gmra.mrb[0].mxu0 %v3780_v17  ;;  %1916 = vmatmul.mubr.bf16.vlgmr.msra.gmra.mrb[0].mxu1 %v3780_v17 }
  0x46   :  { %1843 = vmatpush1.bf16.msra.mxu0 %v3010_v20  ;;  %1925 = vmatpush1.bf16.msra.mxu1 %v3012_v22  ;;  %v420_v20 = vld [vmem:[%s4606_s5 + $0x628] sm:$0xff]  ;;  %v3066_v22 = vcombine.low %v407_v7, %v411_v9  ;;  %v3115_v7 = vcombine.high %v455_v0, %v459_v1  ;;  %v463_v9 = vld [vmem:[%s4606_s5 + $0x780] sm:$0xff] }
  0x47   :  { %1844 = vmatprep.subr.bf16.mxu0 %v3019_v23  ;;  %1926 = vmatprep.subr.bf16.mxu1 %v3021_v25  ;;  %v3068_v23 = vcombine.low %v408_v10, %v412_v12  ;;  %v423_v25 = vld [vmem:[%s4606_s5 + $0x640] sm:$0xff]  ;;  %v3077_v28 = vcombine.high %v416_v18, %v420_v20 }
  0x48   :  { %1874 = vmatprep.mubr.bf16.mxu0 %v3800_v29  ;;  %1956 = vmatprep.mubr.bf16.mxu1 %v3800_v29  ;;  %v3083_v33 = vcombine.high %v423_v25, %v427_v26  ;;  %v467_v10 = vld [vmem:[%s4606_s5 + $0x7a0] sm:$0xff] }
  0x4a   :  { %1845 = vmatpush1.bf16.msra.mxu0 %v3018_v30  ;;  %1927 = vmatpush1.bf16.msra.mxu1 %v3020_v31  ;;  %v428_v30 = vld [vmem:[%s4606_s5 + $0x668] sm:$0xff]  ;;  %v3074_v31 = vcombine.low %v415_v15, %v419_v16  ;;  %v3123_v15 = vcombine.high %v463_v9, %v467_v10  ;;  %v471_v16 = vld [vmem:[%s4606_s5 + $0x7c0] sm:$0xff] }
  0x4b   :  { %1846 = vmatprep.subr.bf16.mxu0 %v3027_v32  ;;  %1928 = vmatprep.subr.bf16.mxu1 %v3029_v36  ;;  %v3076_v32 = vcombine.low %v416_v18, %v420_v20  ;;  %v432_v36 = vld [vmem:[%s4606_s5 + $0x688] sm:$0xff]  ;;  %v3085_v37 = vcombine.high %v424_v27, %v428_v30  ;;  %v475_v18 = vld [vmem:[%s4606_s5 + $0x7e0] sm:$0xff] }
  0x4e   :  { %1847 = vmatpush1.bf16.msra.mxu0 %v3026_v38  ;;  %1929 = vmatpush1.bf16.msra.mxu1 %v3028_v39  ;;  %v436_v38 = vld [vmem:[%s4606_s5 + $0x6a8] sm:$0xff]  ;;  %v3082_v39 = vcombine.low %v423_v25, %v427_v26  ;;  %v3131_v25 = vcombine.high %v471_v16, %v475_v18  ;;  %v225_v26 = vld [vmem:[%s4606_s5 + $0x10] sm:$0xff] }
  0x4f   :  { %1848 = vmatprep.subr.bf16.mxu0 %v3035_v40  ;;  %1930 = vmatprep.subr.bf16.mxu1 %v3037_v45  ;;  %v3084_v40 = vcombine.low %v424_v27, %v428_v30  ;;  %v440_v45 = vld [vmem:[%s4606_s5 + $0x6c8] sm:$0xff]  ;;  %v3093_v46 = vcombine.high %v432_v36, %v436_v38  ;;  %v229_v27 = vld [vmem:[%s4606_s5 + $0x30] sm:$0xff] }
  0x52   :  { %1849 = vmatpush1.bf16.msra.mxu0 %v3034_v47  ;;  %1931 = vmatpush1.bf16.msra.mxu1 %v3036_v48  ;;  %v444_v47 = vld [vmem:[%s4606_s5 + $0x6e8] sm:$0xff]  ;;  %v3090_v48 = vcombine.low %v431_v34, %v435_v35  ;;  %v2887_v34 = vcombine.high %v225_v26, %v229_v27  ;;  %v233_v35 = vld [vmem:[%s4606_s5 + $0x50] sm:$0xff] }
  0x53   :  { %1850 = vmatprep.subr.bf16.mxu0 %v3043_v49  ;;  %1932 = vmatprep.subr.bf16.mxu1 %v3045_v54  ;;  %v3092_v49 = vcombine.low %v432_v36, %v436_v38  ;;  %v448_v54 = vld [vmem:[%s4606_s5 + $0x708] sm:$0xff]  ;;  %v3101_v58 = vcombine.high %v440_v45, %v444_v47  ;;  %v237_v36 = vld [vmem:[%s4606_s5 + $0x70] sm:$0xff] }
  0x56   :  { %1851 = vmatpush1.bf16.msra.mxu0 %v3042_v59  ;;  %1933 = vmatpush1.bf16.msra.mxu1 %v3044_v60  ;;  %v452_v59 = vld [vmem:[%s4606_s5 + $0x728] sm:$0xff]  ;;  %v3098_v60 = vcombine.low %v439_v43, %v443_v44  ;;  %v2895_v44 = vcombine.high %v233_v35, %v237_v36 }
  0x57   :  { %1852 = vmatprep.subr.bf16.mxu0 %v3051_v61  ;;  %1934 = vmatprep.subr.bf16.mxu1 %v3053_v2  ;;  %v3100_v61 = vcombine.low %v440_v45, %v444_v47  ;;  %v456_v2 = vld [vmem:[%s4606_s5 + $0x748] sm:$0xff]  ;;  %v3109_v3 = vcombine.high %v448_v54, %v452_v59 }
  0x5a   :  { %1853 = vmatpush1.bf16.msra.mxu0 %v3050_v4  ;;  %1935 = vmatpush1.bf16.msra.mxu1 %v3052_v5  ;;  %v460_v4 = vld [vmem:[%s4606_s5 + $0x768] sm:$0xff]  ;;  %v3106_v5 = vcombine.low %v447_v52, %v451_v53 }
  0x5b   :  { %1854 = vmatprep.subr.bf16.mxu0 %v3059_v6  ;;  %1936 = vmatprep.subr.bf16.mxu1 %v3061_v11  ;;  %v3108_v6 = vcombine.low %v448_v54, %v452_v59  ;;  %v464_v11 = vld [vmem:[%s4606_s5 + $0x788] sm:$0xff]  ;;  %v3117_v12 = vcombine.high %v456_v2, %v460_v4 }
  0x5e   :  { %1855 = vmatpush1.bf16.msra.mxu0 %v3058_v13  ;;  %1937 = vmatpush1.bf16.msra.mxu1 %v3060_v14  ;;  %v468_v13 = vld [vmem:[%s4606_s5 + $0x7a8] sm:$0xff]  ;;  %v3114_v14 = vcombine.low %v455_v0, %v459_v1 }
  0x5f   :  { %1856 = vmatprep.subr.bf16.mxu0 %v3067_v21  ;;  %1938 = vmatprep.subr.bf16.mxu1 %v3069_v19  ;;  %v3116_v21 = vcombine.low %v456_v2, %v460_v4  ;;  %v472_v19 = vld [vmem:[%s4606_s5 + $0x7c8] sm:$0xff]  ;;  %v3125_v20 = vcombine.high %v464_v11, %v468_v13 }
  0x62   :  { %1857 = vmatpush1.bf16.msra.mxu0 %v3066_v22  ;;  %1939 = vmatpush1.bf16.msra.mxu1 %v3068_v23  ;;  %v476_v22 = vld [vmem:[%s4606_s5 + $0x7e8] sm:$0xff]  ;;  %v3122_v23 = vcombine.low %v463_v9, %v467_v10 }
  0x63   :  { %1858 = vmatprep.subr.bf16.mxu0 %v3075_v24  ;;  %1940 = vmatprep.subr.bf16.mxu1 %v3077_v28  ;;  %v3124_v24 = vcombine.low %v464_v11, %v468_v13  ;;  %v226_v28 = vld [vmem:[%s4606_s5 + $0x18] sm:$0xff]  ;;  %v3133_v30 = vcombine.high %v472_v19, %v476_v22 }
  0x66   :  { %1859 = vmatpush1.bf16.msra.mxu0 %v3074_v31  ;;  %1941 = vmatpush1.bf16.msra.mxu1 %v3076_v32  ;;  %v230_v31 = vld [vmem:[%s4606_s5 + $0x38] sm:$0xff]  ;;  %v3130_v32 = vcombine.low %v471_v16, %v475_v18 }
  0x67   :  { %1860 = vmatprep.subr.bf16.mxu0 %v3083_v33  ;;  %1942 = vmatprep.subr.bf16.mxu1 %v3085_v37  ;;  %v3132_v33 = vcombine.low %v472_v19, %v476_v22  ;;  %v234_v37 = vld [vmem:[%s4606_s5 + $0x58] sm:$0xff]  ;;  %v2889_v38 = vcombine.high %v226_v28, %v230_v31  ;;  %v2888_v43 = vcombine.low %v226_v28, %v230_v31 }
  0x6a   :  { %1861 = vmatpush1.bf16.msra.mxu0 %v3082_v39  ;;  %1943 = vmatpush1.bf16.msra.mxu1 %v3084_v40  ;;  %v238_v39 = vld [vmem:[%s4606_s5 + $0x78] sm:$0xff]  ;;  %v3988_v40 = vpack.c.bf16 %v3764_v8, %v3764_v8 }
  0x6b   :  { %1862 = vmatprep.subr.bf16.mxu0 %v3091_v42  ;;  %1944 = vmatprep.subr.bf16.mxu1 %v3093_v46  ;;  %v2886_v42 = vcombine.low %v225_v26, %v229_v27 }
  0x6e   :  { %1863 = vmatpush1.bf16.msra.mxu0 %v3090_v48  ;;  %1945 = vmatpush1.bf16.msra.mxu1 %v3092_v49 }
  0x6f   :  { %1864 = vmatprep.subr.bf16.mxu0 %v3099_v51  ;;  %1946 = vmatprep.subr.bf16.mxu1 %v3101_v58 }
  0x72   :  { %1865 = vmatpush1.bf16.msra.mxu0 %v3098_v60  ;;  %1947 = vmatpush1.bf16.msra.mxu1 %v3100_v61 }
  0x73   :  { %1866 = vmatprep.subr.bf16.mxu0 %v3107_v63  ;;  %1948 = vmatprep.subr.bf16.mxu1 %v3109_v3 }
  0x76   :  { %1867 = vmatpush1.bf16.msra.mxu0 %v3106_v5  ;;  %1949 = vmatpush1.bf16.msra.mxu1 %v3108_v6 }
  0x77   :  { %1868 = vmatprep.subr.bf16.mxu0 %v3115_v7  ;;  %1950 = vmatprep.subr.bf16.mxu1 %v3117_v12 }
  0x7a   :  { %1869 = vmatpush1.bf16.msra.mxu0 %v3114_v14  ;;  %1951 = vmatpush1.bf16.msra.mxu1 %v3116_v21 }
  0x7b   :  { %1870 = vmatprep.subr.bf16.mxu0 %v3123_v15  ;;  %1952 = vmatprep.subr.bf16.mxu1 %v3125_v20 }
  0x7e   :  { %1871 = vmatpush1.bf16.msra.mxu0 %v3122_v23  ;;  %1953 = vmatpush1.bf16.msra.mxu1 %v3124_v24 }
  0x7f   :  { %1872 = vmatprep.subr.bf16.mxu0 %v3131_v25  ;;  %1954 = vmatprep.subr.bf16.mxu1 %v3133_v30 }
  0x82   :  { %1873 = vmatpush1.bf16.msra.mxu0 %v3130_v32  ;;  %1955 = vmatpush1.bf16.msra.mxu1 %v3132_v33 }
  0x83   :  { %1965 = vmatprep.subr.bf16.mxu0 %v2887_v34 }
  0x84   :  { %18 = vsyncpa [#allocation3], 0  ;;  %2047 = vmatprep.subr.bf16.mxu1 %v2889_v38  ;;  %v2897_v45 = vcombine.high %v234_v37, %v238_v39  ;;  %v241_v46 = vld [vmem:[%s4606_s5 + $0x90] sm:$0xff]  ;;  %v242_v8 = vld [vmem:[%s4606_s5 + $0x98] sm:$0xff]  ;;  %v2894_v49 = vcombine.low %v233_v35, %v237_v36  ;;  %v2896_v51 = vcombine.low %v234_v37, %v238_v39  ;;  %vm2860_vm0 = vcmask 1041408  }
  0x85   :  { %v245_v47 = vld [vmem:[%s4606_s5 + $0xb0] sm:$0xff]  ;;  %1875 = vmatmul.mubr.bf16.vlgmr.msra.gmra.mrb[0].mxu0 %v3988_v40  ;;  %v246_v48 = vld [vmem:[%s4606_s5 + $0xb8] sm:$0xff]  ;;  %1957 = vmatmul.mubr.bf16.vlgmr.msra.gmra.mrb[0].mxu1 %v3988_v40 }
  0x86   :  { %1966 = vmatpush1.bf16.msra.mxu0 %v2886_v42  ;;  %2048 = vmatpush1.bf16.msra.mxu1 %v2888_v43  ;;  %v2903_v52 = vcombine.high %v241_v46, %v245_v47  ;;  %v2905_v53 = vcombine.high %v242_v8, %v246_v48  ;;  %v249_v54 = vld [vmem:[%s4606_s5 + $0xd0] sm:$0xff]  ;;  %v250_v59 = vld [vmem:[%s4606_s5 + $0xd8] sm:$0xff]  ;;  %v2902_v61 = vcombine.low %v241_v46, %v245_v47 }
  0x87   :  { %1967 = vmatprep.subr.bf16.mxu0 %v2895_v44  ;;  %2049 = vmatprep.subr.bf16.mxu1 %v2897_v45  ;;  %v253_v58 = vld [vmem:[%s4606_s5 + $0xf0] sm:$0xff]  ;;  %v254_v60 = vld [vmem:[%s4606_s5 + $0xf8] sm:$0xff]  ;;  %v2904_v63 = vcombine.low %v242_v8, %v246_v48 }
  0x88   :  { %1997 = vmatprep.mubr.bf16.mxu0 %v3747_v62  ;;  %2079 = vmatprep.mubr.bf16.mxu1 %v3747_v62  ;;  %v2911_v0 = vcombine.high %v249_v54, %v253_v58  ;;  %v2913_v1 = vcombine.high %v250_v59, %v254_v60  ;;  %v257_v2 = vld [vmem:[%s4606_s5 + $0x110] sm:$0xff]  ;;  %v258_v62 = vld [vmem:[%s4606_s5 + $0x118] sm:$0xff]  ;;  %v2910_v5 = vcombine.low %v249_v54, %v253_v58 }
  0x89   :  { %v261_v3 = vld [vmem:[%s4606_s5 + $0x130] sm:$0xff]  ;;  %v262_v4 = vld [vmem:[%s4606_s5 + $0x138] sm:$0xff]  ;;  %v2912_v6 = vcombine.low %v250_v59, %v254_v60 }
  0x8a   :  { %1968 = vmatpush1.bf16.msra.mxu0 %v2894_v49  ;;  %2050 = vmatpush1.bf16.msra.mxu1 %v2896_v51  ;;  %v2919_v7 = vcombine.high %v257_v2, %v261_v3  ;;  %v2921_v9 = vcombine.high %v258_v62, %v262_v4  ;;  %v265_v10 = vld [vmem:[%s4606_s5 + $0x150] sm:$0xff]  ;;  %v266_v12 = vld [vmem:[%s4606_s5 + $0x158] sm:$0xff]  ;;  %v2918_v14 = vcombine.low %v257_v2, %v261_v3 }
  0x8b   :  { %1969 = vmatprep.subr.bf16.mxu0 %v2903_v52  ;;  %2051 = vmatprep.subr.bf16.mxu1 %v2905_v53  ;;  %v269_v11 = vld [vmem:[%s4606_s5 + $0x170] sm:$0xff]  ;;  %v270_v13 = vld [vmem:[%s4606_s5 + $0x178] sm:$0xff]  ;;  %v2920_v21 = vcombine.low %v258_v62, %v262_v4 }
  0x8c   :  { %v2927_v15 = vcombine.high %v265_v10, %v269_v11  ;;  %v2929_v16 = vcombine.high %v266_v12, %v270_v13  ;;  %v273_v18 = vld [vmem:[%s4606_s5 + $0x190] sm:$0xff]  ;;  %v274_v20 = vld [vmem:[%s4606_s5 + $0x198] sm:$0xff]  ;;  %v2926_v23 = vcombine.low %v265_v10, %v269_v11  ;;  %v2928_v24 = vcombine.low %v266_v12, %v270_v13 }
  0x8d   :  { %v277_v19 = vld [vmem:[%s4606_s5 + $0x1b0] sm:$0xff]  ;;  %v278_v22 = vld [vmem:[%s4606_s5 + $0x1b8] sm:$0xff] }
  0x8e   :  { %1970 = vmatpush1.bf16.msra.mxu0 %v2902_v61  ;;  %2052 = vmatpush1.bf16.msra.mxu1 %v2904_v63  ;;  %v2935_v25 = vcombine.high %v273_v18, %v277_v19  ;;  %v2937_v26 = vcombine.high %v274_v20, %v278_v22  ;;  %v281_v27 = vld [vmem:[%s4606_s5 + $0x1d0] sm:$0xff]  ;;  %v282_v30 = vld [vmem:[%s4606_s5 + $0x1d8] sm:$0xff]  ;;  %v2934_v32 = vcombine.low %v273_v18, %v277_v19 }
  0x8f   :  { %1971 = vmatprep.subr.bf16.mxu0 %v2911_v0  ;;  %2053 = vmatprep.subr.bf16.mxu1 %v2913_v1  ;;  %v285_v28 = vld [vmem:[%s4606_s5 + $0x1f0] sm:$0xff]  ;;  %v286_v31 = vld [vmem:[%s4606_s5 + $0x1f8] sm:$0xff]  ;;  %v2936_v33 = vcombine.low %v274_v20, %v278_v22 }
  0x90   :  { %v2943_v34 = vcombine.high %v281_v27, %v285_v28  ;;  %v2945_v35 = vcombine.high %v282_v30, %v286_v31  ;;  %v289_v36 = vld [vmem:[%s4606_s5 + $0x210] sm:$0xff]  ;;  %v290_v38 = vld [vmem:[%s4606_s5 + $0x218] sm:$0xff]  ;;  %v2942_v42 = vcombine.low %v281_v27, %v285_v28  ;;  %v2944_v43 = vcombine.low %v282_v30, %v286_v31 }
  0x91   :  { %v293_v37 = vld [vmem:[%s4606_s5 + $0x230] sm:$0xff]  ;;  %v294_v39 = vld [vmem:[%s4606_s5 + $0x238] sm:$0xff] }
  0x92   :  { %1972 = vmatpush1.bf16.msra.mxu0 %v2910_v5  ;;  %2054 = vmatpush1.bf16.msra.mxu1 %v2912_v6  ;;  %v2951_v44 = vcombine.high %v289_v36, %v293_v37  ;;  %v2953_v45 = vcombine.high %v290_v38, %v294_v39  ;;  %v297_v46 = vld [vmem:[%s4606_s5 + $0x250] sm:$0xff]  ;;  %v298_v8 = vld [vmem:[%s4606_s5 + $0x258] sm:$0xff]  ;;  %v2950_v49 = vcombine.low %v289_v36, %v293_v37 }
  0x93   :  { %1973 = vmatprep.subr.bf16.mxu0 %v2919_v7  ;;  %2055 = vmatprep.subr.bf16.mxu1 %v2921_v9  ;;  %v301_v47 = vld [vmem:[%s4606_s5 + $0x270] sm:$0xff]  ;;  %v302_v48 = vld [vmem:[%s4606_s5 + $0x278] sm:$0xff]  ;;  %v2952_v51 = vcombine.low %v290_v38, %v294_v39 }
  0x94   :  { %v2959_v52 = vcombine.high %v297_v46, %v301_v47  ;;  %v2961_v53 = vcombine.high %v298_v8, %v302_v48  ;;  %v305_v54 = vld [vmem:[%s4606_s5 + $0x290] sm:$0xff]  ;;  %v306_v59 = vld [vmem:[%s4606_s5 + $0x298] sm:$0xff]  ;;  %v2958_v61 = vcombine.low %v297_v46, %v301_v47  ;;  %v2960_v63 = vcombine.low %v298_v8, %v302_v48 }
  0x95   :  { %v309_v58 = vld [vmem:[%s4606_s5 + $0x2b0] sm:$0xff]  ;;  %v310_v60 = vld [vmem:[%s4606_s5 + $0x2b8] sm:$0xff] }
  0x96   :  { %1974 = vmatpush1.bf16.msra.mxu0 %v2918_v14  ;;  %2056 = vmatpush1.bf16.msra.mxu1 %v2920_v21  ;;  %v2967_v0 = vcombine.high %v305_v54, %v309_v58  ;;  %v2969_v1 = vcombine.high %v306_v59, %v310_v60  ;;  %v313_v2 = vld [vmem:[%s4606_s5 + $0x2d0] sm:$0xff]  ;;  %v314_v62 = vld [vmem:[%s4606_s5 + $0x2d8] sm:$0xff]  ;;  %v2966_v5 = vcombine.low %v305_v54, %v309_v58 }
  0x97   :  { %1975 = vmatprep.subr.bf16.mxu0 %v2927_v15  ;;  %2057 = vmatprep.subr.bf16.mxu1 %v2929_v16  ;;  %v317_v3 = vld [vmem:[%s4606_s5 + $0x2f0] sm:$0xff]  ;;  %v318_v4 = vld [vmem:[%s4606_s5 + $0x2f8] sm:$0xff]  ;;  %v2968_v6 = vcombine.low %v306_v59, %v310_v60 }
  0x98   :  { %v2975_v7 = vcombine.high %v313_v2, %v317_v3  ;;  %v2977_v9 = vcombine.high %v314_v62, %v318_v4  ;;  %v321_v10 = vld [vmem:[%s4606_s5 + $0x310] sm:$0xff]  ;;  %v322_v12 = vld [vmem:[%s4606_s5 + $0x318] sm:$0xff]  ;;  %v2974_v14 = vcombine.low %v313_v2, %v317_v3  ;;  %v2976_v21 = vcombine.low %v314_v62, %v318_v4 }
  0x99   :  { %v325_v11 = vld [vmem:[%s4606_s5 + $0x330] sm:$0xff]  ;;  %v326_v13 = vld [vmem:[%s4606_s5 + $0x338] sm:$0xff] }
  0x9a   :  { %1976 = vmatpush1.bf16.msra.mxu0 %v2926_v23  ;;  %2058 = vmatpush1.bf16.msra.mxu1 %v2928_v24  ;;  %v2983_v15 = vcombine.high %v321_v10, %v325_v11  ;;  %v2985_v16 = vcombine.high %v322_v12, %v326_v13  ;;  %v329_v18 = vld [vmem:[%s4606_s5 + $0x350] sm:$0xff]  ;;  %v330_v20 = vld [vmem:[%s4606_s5 + $0x358] sm:$0xff]  ;;  %v2982_v23 = vcombine.low %v321_v10, %v325_v11 }
  0x9b   :  { %1977 = vmatprep.subr.bf16.mxu0 %v2935_v25  ;;  %2059 = vmatprep.subr.bf16.mxu1 %v2937_v26  ;;  %v333_v19 = vld [vmem:[%s4606_s5 + $0x370] sm:$0xff]  ;;  %v334_v22 = vld [vmem:[%s4606_s5 + $0x378] sm:$0xff]  ;;  %v2984_v24 = vcombine.low %v322_v12, %v326_v13 }
  0x9c   :  { %v2991_v25 = vcombine.high %v329_v18, %v333_v19  ;;  %v2993_v26 = vcombine.high %v330_v20, %v334_v22  ;;  %v337_v27 = vld [vmem:[%s4606_s5 + $0x390] sm:$0xff]  ;;  %v338_v30 = vld [vmem:[%s4606_s5 + $0x398] sm:$0xff] }
  0x9d   :  { %v341_v28 = vld [vmem:[%s4606_s5 + $0x3b0] sm:$0xff]  ;;  %v342_v31 = vld [vmem:[%s4606_s5 + $0x3b8] sm:$0xff] }
  0x9e   :  { %1978 = vmatpush1.bf16.msra.mxu0 %v2934_v32  ;;  %2060 = vmatpush1.bf16.msra.mxu1 %v2936_v33  ;;  %v2990_v32 = vcombine.low %v329_v18, %v333_v19  ;;  %v2992_v33 = vcombine.low %v330_v20, %v334_v22  ;;  %v345_v36 = vld [vmem:[%s4606_s5 + $0x3d0] sm:$0xff]  ;;  %v346_v38 = vld [vmem:[%s4606_s5 + $0x3d8] sm:$0xff] }
  0x9f   :  { %1979 = vmatprep.subr.bf16.mxu0 %v2943_v34  ;;  %2061 = vmatprep.subr.bf16.mxu1 %v2945_v35  ;;  %v2999_v34 = vcombine.high %v337_v27, %v341_v28  ;;  %v3001_v35 = vcombine.high %v338_v30, %v342_v31  ;;  %v349_v37 = vld [vmem:[%s4606_s5 + $0x3f0] sm:$0xff]  ;;  %v350_v39 = vld [vmem:[%s4606_s5 + $0x3f8] sm:$0xff] }
  0xa0   :  { %v353_v46 = vld [vmem:[%s4606_s5 + $0x410] sm:$0xff]  ;;  %v354_v8 = vld [vmem:[%s4606_s5 + $0x418] sm:$0xff] }
  0xa1   :  { %v357_v47 = vld [vmem:[%s4606_s5 + $0x430] sm:$0xff]  ;;  %v358_v48 = vld [vmem:[%s4606_s5 + $0x438] sm:$0xff] }
  0xa2   :  { %1980 = vmatpush1.bf16.msra.mxu0 %v2942_v42  ;;  %2062 = vmatpush1.bf16.msra.mxu1 %v2944_v43  ;;  %v2998_v42 = vcombine.low %v337_v27, %v341_v28  ;;  %v3000_v43 = vcombine.low %v338_v30, %v342_v31  ;;  %v361_v54 = vld [vmem:[%s4606_s5 + $0x450] sm:$0xff]  ;;  %v362_v59 = vld [vmem:[%s4606_s5 + $0x458] sm:$0xff] }
  0xa3   :  { %1981 = vmatprep.subr.bf16.mxu0 %v2951_v44  ;;  %2063 = vmatprep.subr.bf16.mxu1 %v2953_v45  ;;  %v3007_v44 = vcombine.high %v345_v36, %v349_v37  ;;  %v3009_v45 = vcombine.high %v346_v38, %v350_v39  ;;  %v365_v58 = vld [vmem:[%s4606_s5 + $0x470] sm:$0xff]  ;;  %v366_v60 = vld [vmem:[%s4606_s5 + $0x478] sm:$0xff] }
  0xa4   :  { %v369_v2 = vld [vmem:[%s4606_s5 + $0x490] sm:$0xff]  ;;  %v370_v62 = vld [vmem:[%s4606_s5 + $0x498] sm:$0xff] }
  0xa5   :  { %v373_v3 = vld [vmem:[%s4606_s5 + $0x4b0] sm:$0xff]  ;;  %v374_v4 = vld [vmem:[%s4606_s5 + $0x4b8] sm:$0xff] }
  0xa6   :  { %1982 = vmatpush1.bf16.msra.mxu0 %v2950_v49  ;;  %2064 = vmatpush1.bf16.msra.mxu1 %v2952_v51  ;;  %v3006_v49 = vcombine.low %v345_v36, %v349_v37  ;;  %v3008_v51 = vcombine.low %v346_v38, %v350_v39  ;;  %v377_v10 = vld [vmem:[%s4606_s5 + $0x4d0] sm:$0xff]  ;;  %v382_v12 = vld [vmem:[%s4606_s5 + $0x4f8] sm:$0xff]  ;;  %v3030_v13 = vcombine.low %v369_v2, %v373_v3 }
  0xa7   :  { %1983 = vmatprep.subr.bf16.mxu0 %v2959_v52  ;;  %2065 = vmatprep.subr.bf16.mxu1 %v2961_v53  ;;  %v3015_v52 = vcombine.high %v353_v46, %v357_v47  ;;  %v3017_v53 = vcombine.high %v354_v8, %v358_v48  ;;  %v381_v11 = vld [vmem:[%s4606_s5 + $0x4f0] sm:$0xff]  ;;  %v390_v19 = vld [vmem:[%s4606_s5 + $0x538] sm:$0xff] }
  0xa8   :  { %v389_v18 = vld [vmem:[%s4606_s5 + $0x530] sm:$0xff]  ;;  %v3038_v20 = vcombine.low %v377_v10, %v381_v11  ;;  %v394_v27 = vld [vmem:[%s4606_s5 + $0x558] sm:$0xff] }
  0xa9   :  { %v398_v28 = vld [vmem:[%s4606_s5 + $0x578] sm:$0xff] }
  0xaa   :  { %1984 = vmatpush1.bf16.msra.mxu0 %v2958_v61  ;;  %2066 = vmatpush1.bf16.msra.mxu1 %v2960_v63  ;;  %v3014_v61 = vcombine.low %v353_v46, %v357_v47  ;;  %v3016_v63 = vcombine.low %v354_v8, %v358_v48  ;;  %v402_v36 = vld [vmem:[%s4606_s5 + $0x598] sm:$0xff]  ;;  %v3056_v39 = vcombine.low %v394_v27, %v398_v28 }
  0xab   :  { %1985 = vmatprep.subr.bf16.mxu0 %v2967_v0  ;;  %2067 = vmatprep.subr.bf16.mxu1 %v2969_v1  ;;  %v3023_v0 = vcombine.high %v361_v54, %v365_v58  ;;  %v3025_v1 = vcombine.high %v362_v59, %v366_v60  ;;  %v406_v37 = vld [vmem:[%s4606_s5 + $0x5b8] sm:$0xff] }
  0xac   :  { %v410_v46 = vld [vmem:[%s4606_s5 + $0x5d8] sm:$0xff]  ;;  %v3064_v48 = vcombine.low %v402_v36, %v406_v37 }
  0xad   :  { %v414_v47 = vld [vmem:[%s4606_s5 + $0x5f8] sm:$0xff] }
  0xae   :  { %1986 = vmatpush1.bf16.msra.mxu0 %v2966_v5  ;;  %2068 = vmatpush1.bf16.msra.mxu1 %v2968_v6  ;;  %v3022_v5 = vcombine.low %v361_v54, %v365_v58  ;;  %v3024_v6 = vcombine.low %v362_v59, %v366_v60  ;;  %v418_v54 = vld [vmem:[%s4606_s5 + $0x618] sm:$0xff]  ;;  %v3072_v60 = vcombine.low %v410_v46, %v414_v47 }
  0xaf   :  { %1987 = vmatprep.subr.bf16.mxu0 %v2975_v7  ;;  %2069 = vmatprep.subr.bf16.mxu1 %v2977_v9  ;;  %v3031_v7 = vcombine.high %v369_v2, %v373_v3  ;;  %v3033_v9 = vcombine.high %v370_v62, %v374_v4  ;;  %v422_v58 = vld [vmem:[%s4606_s5 + $0x638] sm:$0xff] }
  0xb0   :  { %v426_v2 = vld [vmem:[%s4606_s5 + $0x658] sm:$0xff] }
  0xb1   :  { %v430_v3 = vld [vmem:[%s4606_s5 + $0x678] sm:$0xff] }
  0xb2   :  { %1988 = vmatpush1.bf16.msra.mxu0 %v2974_v14  ;;  %2070 = vmatpush1.bf16.msra.mxu1 %v2976_v21  ;;  %v3032_v14 = vcombine.low %v370_v62, %v374_v4  ;;  %v3039_v21 = vcombine.high %v377_v10, %v381_v11  ;;  %v3080_v4 = vcombine.low %v418_v54, %v422_v58  ;;  %v434_v10 = vld [vmem:[%s4606_s5 + $0x698] sm:$0xff] }
  0xb3   :  { %1989 = vmatprep.subr.bf16.mxu0 %v2983_v15  ;;  %2071 = vmatprep.subr.bf16.mxu1 %v2985_v16  ;;  %v385_v16 = vld [vmem:[%s4606_s5 + $0x510] sm:$0xff]  ;;  %v438_v11 = vld [vmem:[%s4606_s5 + $0x6b8] sm:$0xff] }
  0xb4   :  { %v3046_v30 = vcombine.low %v385_v16, %v389_v18 }
  0xb6   :  { %1990 = vmatpush1.bf16.msra.mxu0 %v2982_v23  ;;  %2072 = vmatpush1.bf16.msra.mxu1 %v2984_v24  ;;  %v3047_v23 = vcombine.high %v385_v16, %v389_v18  ;;  %v442_v16 = vld [vmem:[%s4606_s5 + $0x6d8] sm:$0xff] }
  0xb7   :  { %1991 = vmatprep.subr.bf16.mxu0 %v2991_v25  ;;  %2073 = vmatprep.subr.bf16.mxu1 %v2993_v26  ;;  %v393_v25 = vld [vmem:[%s4606_s5 + $0x550] sm:$0xff]  ;;  %v446_v18 = vld [vmem:[%s4606_s5 + $0x6f8] sm:$0xff] }
  0xb8   :  { %v397_v26 = vld [vmem:[%s4606_s5 + $0x570] sm:$0xff] }
  0xb9   :  { %v3054_v38 = vcombine.low %v393_v25, %v397_v26 }
  0xba   :  { %1992 = vmatpush1.bf16.msra.mxu0 %v2990_v32  ;;  %2074 = vmatpush1.bf16.msra.mxu1 %v2992_v33  ;;  %v3055_v32 = vcombine.high %v393_v25, %v397_v26  ;;  %v3057_v33 = vcombine.high %v394_v27, %v398_v28  ;;  %v450_v25 = vld [vmem:[%s4606_s5 + $0x718] sm:$0xff]  ;;  %v3104_v28 = vcombine.low %v442_v16, %v446_v18 }
  0xbb   :  { %1993 = vmatprep.subr.bf16.mxu0 %v2999_v34  ;;  %2075 = vmatprep.subr.bf16.mxu1 %v3001_v35  ;;  %v401_v34 = vld [vmem:[%s4606_s5 + $0x590] sm:$0xff]  ;;  %v454_v26 = vld [vmem:[%s4606_s5 + $0x738] sm:$0xff] }
  0xbc   :  { %v405_v35 = vld [vmem:[%s4606_s5 + $0x5b0] sm:$0xff] }
  0xbd   :  { %v3062_v8 = vcombine.low %v401_v34, %v405_v35 }
  0xbe   :  { %1994 = vmatpush1.bf16.msra.mxu0 %v2998_v42  ;;  %2076 = vmatpush1.bf16.msra.mxu1 %v3000_v43  ;;  %v3063_v42 = vcombine.high %v401_v34, %v405_v35  ;;  %v3065_v43 = vcombine.high %v402_v36, %v406_v37  ;;  %v458_v34 = vld [vmem:[%s4606_s5 + $0x758] sm:$0xff]  ;;  %v3112_v37 = vcombine.low %v450_v25, %v454_v26 }
  0xbf   :  { %1995 = vmatprep.subr.bf16.mxu0 %v3007_v44  ;;  %2077 = vmatprep.subr.bf16.mxu1 %v3009_v45  ;;  %v409_v44 = vld [vmem:[%s4606_s5 + $0x5d0] sm:$0xff]  ;;  %v462_v35 = vld [vmem:[%s4606_s5 + $0x778] sm:$0xff] }
  0xc0   :  { %v413_v45 = vld [vmem:[%s4606_s5 + $0x5f0] sm:$0xff] }
  0xc1   :  { %v3070_v59 = vcombine.low %v409_v44, %v413_v45 }
  0xc2   :  { %1996 = vmatpush1.bf16.msra.mxu0 %v3006_v49  ;;  %2078 = vmatpush1.bf16.msra.mxu1 %v3008_v51  ;;  %v3071_v49 = vcombine.high %v409_v44, %v413_v45  ;;  %v3073_v51 = vcombine.high %v410_v46, %v414_v47  ;;  %v466_v44 = vld [vmem:[%s4606_s5 + $0x798] sm:$0xff]  ;;  %v3120_v47 = vcombine.low %v458_v34, %v462_v35 }
  0xc3   :  { %2006 = vmatprep.subr.bf16.mxu0 %v3015_v52  ;;  %2088 = vmatprep.subr.bf16.mxu1 %v3017_v53  ;;  %v417_v52 = vld [vmem:[%s4606_s5 + $0x610] sm:$0xff]  ;;  %v470_v45 = vld [vmem:[%s4606_s5 + $0x7b8] sm:$0xff] }
  0xc4   :  { %v421_v53 = vld [vmem:[%s4606_s5 + $0x630] sm:$0xff] }
  0xc5   :  { %1998 = vmatmul.mubr.bf16.vlgmr.msra.gmra.mrb[4].mxu0 %v3780_v17  ;;  %2080 = vmatmul.mubr.bf16.vlgmr.msra.gmra.mrb[4].mxu1 %v3780_v17  ;;  %v378_v17 = vld [vmem:[%s4606_s5 + $0x4d8] sm:$0xff]  ;;  %v3078_v62 = vcombine.low %v417_v52, %v421_v53 }
  0xc6   :  { %2007 = vmatpush1.bf16.msra.mxu0 %v3014_v61  ;;  %2089 = vmatpush1.bf16.msra.mxu1 %v3016_v63  ;;  %v3041_v15 = vcombine.high %v378_v17, %v382_v12  ;;  %v3040_v22 = vcombine.low %v378_v17, %v382_v12  ;;  %v3079_v61 = vcombine.high %v417_v52, %v421_v53  ;;  %v474_v52 = vld [vmem:[%s4606_s5 + $0x7d8] sm:$0xff] }
  0xc7   :  { %2008 = vmatprep.subr.bf16.mxu0 %v3023_v0  ;;  %2090 = vmatprep.subr.bf16.mxu1 %v3025_v1  ;;  %v3081_v63 = vcombine.high %v418_v54, %v422_v58  ;;  %v425_v0 = vld [vmem:[%s4606_s5 + $0x650] sm:$0xff]  ;;  %v3088_v12 = vcombine.low %v426_v2, %v430_v3  ;;  %v478_v53 = vld [vmem:[%s4606_s5 + $0x7f8] sm:$0xff]  ;;  %v3128_v58 = vcombine.low %v466_v44, %v470_v45 }
  0xc8   :  { %2038 = vmatprep.mubr.bf16.mxu0 %v3800_v29  ;;  %2120 = vmatprep.mubr.bf16.mxu1 %v3800_v29  ;;  %v386_v29 = vld [vmem:[%s4606_s5 + $0x518] sm:$0xff]  ;;  %v429_v1 = vld [vmem:[%s4606_s5 + $0x670] sm:$0xff] }
  0xc9   :  { %v3049_v24 = vcombine.high %v386_v29, %v390_v19  ;;  %v3048_v31 = vcombine.low %v386_v29, %v390_v19  ;;  %v3086_v17 = vcombine.low %v425_v0, %v429_v1  ;;  %v3096_v19 = vcombine.low %v434_v10, %v438_v11 }
  0xca   :  { %2009 = vmatpush1.bf16.msra.mxu0 %v3022_v5  ;;  %2091 = vmatpush1.bf16.msra.mxu1 %v3024_v6  ;;  %v3087_v5 = vcombine.high %v425_v0, %v429_v1  ;;  %v3089_v6 = vcombine.high %v426_v2, %v430_v3  ;;  %v3320_v0 = vld [vmem:[%s4608_s7 + $0x40] sm:$0xff]  }
  0xcb   :  { %2010 = vmatprep.subr.bf16.mxu0 %v3031_v7  ;;  %2092 = vmatprep.subr.bf16.mxu1 %v3033_v9  ;;  %v433_v7 = vld [vmem:[%s4606_s5 + $0x690] sm:$0xff]  ;;  %v3321_v1 = vld [vmem:[%s4608_s7 + $0xc0] sm:$0xff]  }
  0xcc   :  { %v437_v9 = vld [vmem:[%s4606_s5 + $0x6b0] sm:$0xff]  ;;  %v3322_v2 = vld [vmem:[%s4608_s7] sm:$0xff]  }
  0xcd   :  { %v3094_v29 = vcombine.low %v433_v7, %v437_v9  ;;  %v3323_v3 = vld [vmem:[%s4608_s7 + $0x80] sm:$0xff]  }
  0xce   :  { %2011 = vmatpush1.bf16.msra.mxu0 %v3030_v13  ;;  %2093 = vmatpush1.bf16.msra.mxu1 %v3032_v14  ;;  %v3095_v13 = vcombine.high %v433_v7, %v437_v9  ;;  %v3097_v14 = vcombine.high %v434_v10, %v438_v11  ;;  %v3328_v7 = vld [vmem:[%s4608_s7 + $0x50] sm:$0xff]   ;;  %v3332_v11 = vld [vmem:[%s4608_s7 + $0x58] sm:$0xff]  }
  0xcf   :  { %2012 = vmatprep.subr.bf16.mxu0 %v3039_v21  ;;  %2094 = vmatprep.subr.bf16.mxu1 %v3041_v15  ;;  %v441_v21 = vld [vmem:[%s4606_s5 + $0x6d0] sm:$0xff] }
  0xd0   :  { %v445_v15 = vld [vmem:[%s4606_s5 + $0x6f0] sm:$0xff] }
  0xd1   :  { %v3102_v27 = vcombine.low %v441_v21, %v445_v15  ;;  %v3330_v9 = vld [vmem:[%s4608_s7 + $0x10] sm:$0xff]  }
  0xd2   :  { %2013 = vmatpush1.bf16.msra.mxu0 %v3038_v20  ;;  %2095 = vmatpush1.bf16.msra.mxu1 %v3040_v22  ;;  %v3103_v20 = vcombine.high %v441_v21, %v445_v15  ;;  %v3105_v22 = vcombine.high %v442_v16, %v446_v18  ;;  %v3331_v10 = vld [vmem:[%s4608_s7 + $0x90] sm:$0xff]   ;;  %v3337_v21 = vld [vmem:[%s4608_s7 + $0xe0] sm:$0xff]   ;;  %v3340_v18 = vld [vmem:[%s4608_s7 + $0x68] sm:$0xff]  }
  0xd3   :  { %2014 = vmatprep.subr.bf16.mxu0 %v3047_v23  ;;  %2096 = vmatprep.subr.bf16.mxu1 %v3049_v24  ;;  %v449_v23 = vld [vmem:[%s4606_s5 + $0x710] sm:$0xff]  ;;  %v3338_v15 = vld [vmem:[%s4608_s7 + $0x20] sm:$0xff]  }
  0xd4   :  { %v453_v24 = vld [vmem:[%s4606_s5 + $0x730] sm:$0xff]  ;;  %v3339_v16 = vld [vmem:[%s4608_s7 + $0xa0] sm:$0xff]  }
  0xd5   :  { %v3110_v36 = vcombine.low %v449_v23, %v453_v24 }
  0xd6   :  { %2015 = vmatpush1.bf16.msra.mxu0 %v3046_v30  ;;  %2097 = vmatpush1.bf16.msra.mxu1 %v3048_v31  ;;  %v3111_v30 = vcombine.high %v449_v23, %v453_v24  ;;  %v3113_v31 = vcombine.high %v450_v25, %v454_v26  ;;  %v3345_v23 = vld [vmem:[%s4608_s7 + $0xf0] sm:$0xff]   ;;  %v3348_v26 = vld [vmem:[%s4608_s7 + $0x78] sm:$0xff]  }
  0xd7   :  { %2016 = vmatprep.subr.bf16.mxu0 %v3055_v32  ;;  %2098 = vmatprep.subr.bf16.mxu1 %v3057_v33  ;;  %v457_v32 = vld [vmem:[%s4606_s5 + $0x750] sm:$0xff] }
  0xd8   :  { %v461_v33 = vld [vmem:[%s4606_s5 + $0x770] sm:$0xff] }
  0xd9   :  { %v3118_v46 = vcombine.low %v457_v32, %v461_v33  ;;  %v3346_v24 = vld [vmem:[%s4608_s7 + $0x30] sm:$0xff]  }
  0xda   :  { %2017 = vmatpush1.bf16.msra.mxu0 %v3054_v38  ;;  %2099 = vmatpush1.bf16.msra.mxu1 %v3056_v39  ;;  %v3119_v38 = vcombine.high %v457_v32, %v461_v33  ;;  %v3121_v39 = vcombine.high %v458_v34, %v462_v35  ;;  %v3347_v25 = vld [vmem:[%s4608_s7 + $0xb0] sm:$0xff]   ;;  %v3353_v32 = vld [vmem:[%s4608_s7 + $0x1c0] sm:$0xff]  }
  0xdb   :  { %2018 = vmatprep.subr.bf16.mxu0 %v3063_v42  ;;  %2100 = vmatprep.subr.bf16.mxu1 %v3065_v43  ;;  %v465_v42 = vld [vmem:[%s4606_s5 + $0x790] sm:$0xff]  ;;  %v4465_v33 = vld [vmem:[%s4607_s6] sm:$0xff] }
  0xdc   :  { %v469_v43 = vld [vmem:[%s4606_s5 + $0x7b0] sm:$0xff]  ;;  %v484_v34 = vrot.slane %v4465_v33, %v3585_v50  ;;  %v492_v35 = vrot.slane %v4465_v33, %v3597_v56 }
  0xdd   :  { %v3126_v54 = vcombine.low %v465_v42, %v469_v43 }
  0xde   :  { %2019 = vmatpush1.bf16.msra.mxu0 %v3062_v8  ;;  %2101 = vmatpush1.bf16.msra.mxu1 %v3064_v48  ;;  %v3127_v8 = vcombine.high %v465_v42, %v469_v43  ;;  %v3129_v48 = vcombine.high %v466_v44, %v470_v45 }
  0xdf   :  { %2020 = vmatprep.subr.bf16.mxu0 %v3071_v49  ;;  %2102 = vmatprep.subr.bf16.mxu1 %v3073_v51  ;;  %v473_v49 = vld [vmem:[%s4606_s5 + $0x7d0] sm:$0xff] }
  0xe0   :  { %v477_v51 = vld [vmem:[%s4606_s5 + $0x7f0] sm:$0xff] }
  0xe2   :  { %2021 = vmatpush1.bf16.msra.mxu0 %v3070_v59  ;;  %2103 = vmatpush1.bf16.msra.mxu1 %v3072_v60  ;;  %v3135_v59 = vcombine.high %v473_v49, %v477_v51  ;;  %v3137_v60 = vcombine.high %v474_v52, %v478_v53 }
  0xe3   :  { %2022 = vmatprep.subr.bf16.mxu0 %v3079_v61  ;;  %2104 = vmatprep.subr.bf16.mxu1 %v3081_v63  ;;  %v3134_v61 = vcombine.low %v473_v49, %v477_v51  ;;  %v3136_v63 = vcombine.low %v474_v52, %v478_v53 }
  0xe6   :  { %2023 = vmatpush1.bf16.msra.mxu0 %v3078_v62  ;;  %2105 = vmatpush1.bf16.msra.mxu1 %v3080_v4  ;;  %v3324_v62 = vld [vmem:[%s4608_s7 + $0x48] sm:$0xff]  }
  0xe7   :  { %2024 = vmatprep.subr.bf16.mxu0 %v3087_v5  ;;  %2106 = vmatprep.subr.bf16.mxu1 %v3089_v6  ;;  %v3325_v4 = vld [vmem:[%s4608_s7 + $0xc8] sm:$0xff]  }
  0xe8   :  { %v3326_v5 = vld [vmem:[%s4608_s7 + $0x8] sm:$0xff]  }
  0xe9   :  { %v3327_v6 = vld [vmem:[%s4608_s7 + $0x88] sm:$0xff]  }
  0xea   :  { %2025 = vmatpush1.bf16.msra.mxu0 %v3086_v17  ;;  %2107 = vmatpush1.bf16.msra.mxu1 %v3088_v12  ;;  %v3333_v17 = vld [vmem:[%s4608_s7 + $0xd8] sm:$0xff]  }
  0xeb   :  { %2026 = vmatprep.subr.bf16.mxu0 %v3095_v13  ;;  %2108 = vmatprep.subr.bf16.mxu1 %v3097_v14  ;;  %v3334_v12 = vld [vmem:[%s4608_s7 + $0x18] sm:$0xff]   ;;  %v3336_v14 = vld [vmem:[%s4608_s7 + $0x60] sm:$0xff]  }
  0xec   :  { %v3335_v13 = vld [vmem:[%s4608_s7 + $0x98] sm:$0xff]  }
  0xee   :  { %2027 = vmatpush1.bf16.msra.mxu0 %v3094_v29  ;;  %2109 = vmatpush1.bf16.msra.mxu1 %v3096_v19  ;;  %v3341_v29 = vld [vmem:[%s4608_s7 + $0xe8] sm:$0xff]  }
  0xef   :  { %2028 = vmatprep.subr.bf16.mxu0 %v3103_v20  ;;  %2110 = vmatprep.subr.bf16.mxu1 %v3105_v22  ;;  %v3342_v19 = vld [vmem:[%s4608_s7 + $0x28] sm:$0xff]   ;;  %v3344_v22 = vld [vmem:[%s4608_s7 + $0x70] sm:$0xff]  }
  0xf0   :  { %v3343_v20 = vld [vmem:[%s4608_s7 + $0xa8] sm:$0xff]  }
  0xf2   :  { %2029 = vmatpush1.bf16.msra.mxu0 %v3102_v27  ;;  %2111 = vmatpush1.bf16.msra.mxu1 %v3104_v28  ;;  %v3349_v27 = vld [vmem:[%s4608_s7 + $0xf8] sm:$0xff]  }
  0xf3   :  { %2030 = vmatprep.subr.bf16.mxu0 %v3111_v30  ;;  %2112 = vmatprep.subr.bf16.mxu1 %v3113_v31  ;;  %v3350_v28 = vld [vmem:[%s4608_s7 + $0x38] sm:$0xff]   ;;  %v3352_v31 = vld [vmem:[%s4608_s7 + $0x140] sm:$0xff]  }
  0xf4   :  { %v3351_v30 = vld [vmem:[%s4608_s7 + $0xb8] sm:$0xff]  }
  0xf6   :  { %2031 = vmatpush1.bf16.msra.mxu0 %v3110_v36  ;;  %2113 = vmatpush1.bf16.msra.mxu1 %v3112_v37  ;;  %v488_v36 = vrot.slane %v4465_v33, %v3594_v55  ;;  %v496_v37 = vrot.slane %v4465_v33, %v3600_v57 }
  0xf7   :  { %2032 = vmatprep.subr.bf16.mxu0 %v3119_v38  ;;  %2114 = vmatprep.subr.bf16.mxu1 %v3121_v39 }
  0xfa   :  { %2033 = vmatpush1.bf16.msra.mxu0 %v3118_v46  ;;  %2115 = vmatpush1.bf16.msra.mxu1 %v3120_v47 }
  0xfb   :  { %2034 = vmatprep.subr.bf16.mxu0 %v3127_v8  ;;  %2116 = vmatprep.subr.bf16.mxu1 %v3129_v48 }
  0xfe   :  { %2035 = vmatpush1.bf16.msra.mxu0 %v3126_v54  ;;  %2117 = vmatpush1.bf16.msra.mxu1 %v3128_v58  ;;  %v3354_v54 = vld [vmem:[%s4608_s7 + $0x100] sm:$0xff]  }
  0xff   :  { %2036 = vmatprep.subr.bf16.mxu0 %v3135_v59  ;;  %2118 = vmatprep.subr.bf16.mxu1 %v3137_v60  ;;  %v3355_v60 = vld [vmem:[%s4608_s7 + $0x180] sm:$0xff]  }
 0x102   :  { %2037 = vmatpush1.bf16.msra.mxu0 %v3134_v61  ;;  %2119 = vmatpush1.bf16.msra.mxu1 %v3136_v63  ;;  %v3356_v61 = vld [vmem:[%s4608_s7 + $0x148] sm:$0xff]  }
 0x103   :  { %3206 = vmatprep.subr.bf16.mxu0 %v3320_v0  ;;  %3228 = vmatprep.subr.bf16.mxu1 %v3321_v1  ;;  %v3357_v0 = vld [vmem:[%s4608_s7 + $0x1c8] sm:$0xff]  }
 0x104   :  { %v3358_v1 = vld [vmem:[%s4608_s7 + $0x108] sm:$0xff]  }
 0x105   :  { %2039 = vmatmul.mubr.bf16.vlgmr.msra.gmra.mrb[4].mxu0 %v3988_v40  ;;  %2121 = vmatmul.mubr.bf16.vlgmr.msra.gmra.mrb[4].mxu1 %v3988_v40  ;;  %v3329_v40 = vld [vmem:[%s4608_s7 + $0xd0] sm:$0xff]  }
 0x106   :  { %3207 = vmatpush3.bf16.msra.mxu0 %v3322_v2  ;;  %3229 = vmatpush3.bf16.msra.mxu1 %v3323_v3  ;;  %v3359_v2 = vld [vmem:[%s4608_s7 + $0x188] sm:$0xff]   ;;  %v3360_v3 = vld [vmem:[%s4608_s7 + $0x150] sm:$0xff]  }
 0x107   :  { %3208 = vmatprep.subr.bf16.mxu0 %v3324_v62  ;;  %3230 = vmatprep.subr.bf16.mxu1 %v3325_v4  ;;  %v3361_v62 = vld [vmem:[%s4608_s7 + $0x1d0] sm:$0xff]  }
 0x108   :  { %v3362_v4 = vld [vmem:[%s4608_s7 + $0x110] sm:$0xff]  }
 0x10a   :  { %3209 = vmatpush3.bf16.msra.mxu0 %v3326_v5  ;;  %3231 = vmatpush3.bf16.msra.mxu1 %v3327_v6  ;;  %v3363_v5 = vld [vmem:[%s4608_s7 + $0x190] sm:$0xff]   ;;  %v3364_v6 = vld [vmem:[%s4608_s7 + $0x158] sm:$0xff]  }
 0x10b   :  { %3210 = vmatprep.subr.bf16.mxu0 %v3328_v7  ;;  %3232 = vmatprep.subr.bf16.mxu1 %v3329_v40  ;;  %v3365_v7 = vld [vmem:[%s4608_s7 + $0x1d8] sm:$0xff]  }
 0x10c   :  { %v3366_v40 = vld [vmem:[%s4608_s7 + $0x118] sm:$0xff]  }
 0x10e   :  { %3211 = vmatpush3.bf16.msra.mxu0 %v3330_v9  ;;  %3233 = vmatpush3.bf16.msra.mxu1 %v3331_v10  ;;  %v3367_v9 = vld [vmem:[%s4608_s7 + $0x198] sm:$0xff]   ;;  %v3368_v10 = vld [vmem:[%s4608_s7 + $0x160] sm:$0xff]  }
 0x10f   :  { %3212 = vmatprep.subr.bf16.mxu0 %v3332_v11  ;;  %3234 = vmatprep.subr.bf16.mxu1 %v3333_v17  ;;  %v3369_v11 = vld [vmem:[%s4608_s7 + $0x1e0] sm:$0xff]  }
 0x110   :  { %v3370_v17 = vld [vmem:[%s4608_s7 + $0x120] sm:$0xff]  }
 0x112   :  { %3213 = vmatpush3.bf16.msra.mxu0 %v3334_v12  ;;  %3235 = vmatpush3.bf16.msra.mxu1 %v3335_v13  ;;  %v3371_v12 = vld [vmem:[%s4608_s7 + $0x1a0] sm:$0xff]   ;;  %v3372_v13 = vld [vmem:[%s4608_s7 + $0x168] sm:$0xff]  }
 0x113   :  { %3214 = vmatprep.subr.bf16.mxu0 %v3336_v14  ;;  %3236 = vmatprep.subr.bf16.mxu1 %v3337_v21  ;;  %v3373_v14 = vld [vmem:[%s4608_s7 + $0x1e8] sm:$0xff]  }
 0x114   :  { %v3374_v21 = vld [vmem:[%s4608_s7 + $0x128] sm:$0xff]  }
 0x116   :  { %3215 = vmatpush3.bf16.msra.mxu0 %v3338_v15  ;;  %3237 = vmatpush3.bf16.msra.mxu1 %v3339_v16  ;;  %v3375_v15 = vld [vmem:[%s4608_s7 + $0x1a8] sm:$0xff]   ;;  %v3376_v16 = vld [vmem:[%s4608_s7 + $0x170] sm:$0xff]  }
 0x117   :  { %3216 = vmatprep.subr.bf16.mxu0 %v3340_v18  ;;  %3238 = vmatprep.subr.bf16.mxu1 %v3341_v29  ;;  %v3377_v18 = vld [vmem:[%s4608_s7 + $0x1f0] sm:$0xff]  }
 0x118   :  { %v3378_v29 = vld [vmem:[%s4608_s7 + $0x130] sm:$0xff]  }
 0x11a   :  { %3217 = vmatpush3.bf16.msra.mxu0 %v3342_v19  ;;  %3239 = vmatpush3.bf16.msra.mxu1 %v3343_v20  ;;  %v3379_v19 = vld [vmem:[%s4608_s7 + $0x1b0] sm:$0xff]   ;;  %v3380_v20 = vld [vmem:[%s4608_s7 + $0x178] sm:$0xff]  }
 0x11b   :  { %3218 = vmatprep.subr.bf16.mxu0 %v3344_v22  ;;  %3240 = vmatprep.subr.bf16.mxu1 %v3345_v23  ;;  %v3381_v22 = vld [vmem:[%s4608_s7 + $0x1f8] sm:$0xff]  }
 0x11c   :  { %v3382_v23 = vld [vmem:[%s4608_s7 + $0x138] sm:$0xff]  }
 0x11e   :  { %3219 = vmatpush3.bf16.msra.mxu0 %v3346_v24  ;;  %3241 = vmatpush3.bf16.msra.mxu1 %v3347_v25  ;;  %v3383_v24 = vld [vmem:[%s4608_s7 + $0x1b8] sm:$0xff]   ;;  %v499_v25 = vsub.s32 4, %v3570_v41 }
 0x11f   :  { %3220 = vmatprep.subr.bf16.mxu0 %v3348_v26  ;;  %3242 = vmatprep.subr.bf16.mxu1 %v3349_v27  ;;  %v507_v26 = vsub.s32 6, %v3570_v41  ;;  %v503_v27 = vsub.s32 5, %v3570_v41 }
 0x122   :  { %3221 = vmatpush3.bf16.msra.mxu0 %v3350_v28  ;;  %3243 = vmatpush3.bf16.msra.mxu1 %v3351_v30  ;;  %v511_v28 = vsub.s32 7, %v3570_v41  ;;  %v500_v30 = vrot.slane %v4465_v33, %v499_v25 }
 0x123   :  { %3250 = vmatprep.subr.bf16.mxu0 %v3352_v31  ;;  %3272 = vmatprep.subr.bf16.mxu1 %v3353_v32  ;;  %v508_v31 = vrot.slane %v4465_v33, %v507_v26  ;;  %v504_v32 = vrot.slane %v4465_v33, %v503_v27 }
 0x158   :  { %v1876_v38 = vpop.f32.mrb[0].mxu0  ;;  %v1958_v42 = vpop.f32.mrb[0].mxu1 }
 0x159   :  { %v3294_v39 = vadd.f32 %v1876_v38, %v484_v34  ;;  %v1878_v43 = vpop.f32.mrb[1].mxu0  ;;  %v3296_v44 = vadd.f32 %v1958_v42, %v492_v35  ;;  %v1960_v46 = vpop.f32.mrb[1].mxu1  ;;  %v512_v34 = vrot.slane %v4465_v33, %v511_v28 }
 0x15a   :  { %v3295_v45 = vadd.f32 %v1878_v43, %v488_v36  ;;  %v1880_v47 = vpop.f32.mrb[2].mxu0  ;;  %v3297_v8 = vadd.f32 %v1960_v46, %v496_v37  ;;  %v1962_v48 = vpop.f32.mrb[2].mxu1 }
 0x15b   :  { %3386 = vtanh.f32 %v3294_v39  ;;  %v1881_v49 = vpop.f32.mrb[3].mxu0  ;;  %v1963_v56 = vpop.f32.mrb[3].mxu1 }
 0x15c   :  { %3388 = vtanh.f32 %v3296_v44 }
 0x15d   :  { %3390 = vtanh.f32 %v3295_v45 }
 0x15e   :  { %3392 = vtanh.f32 %v3297_v8 }
 0x165   :  { %v3387_v55 = vpop.eup %3386 }
 0x166   :  { %v3389_v51 = vpop.eup %3388  ;;  %v2137_v58 = vpack.c.bf16 %v3387_v55, %v3387_v55 }
 0x167   :  { %v3391_v52 = vpop.eup %3390  ;;  %v2139_v63 = vpack.c.bf16 %v3389_v51, %v3389_v51 }
 0x168   :  { %v3393_v57 = vpop.eup %3392  ;;  %v2138_v53 = vpack.c.bf16 %v3391_v52, %v3391_v52 }
 0x169   :  { %v2140_v59 = vpack.c.bf16 %v3393_v57, %v3393_v57 }
 0x16a   :  { %2696 = vmatprep.mubr.bf16.mxu0 %v2138_v53 }
 0x16b   :  { %2736 = vmatprep.mubr.bf16.mxu1 %v2140_v59  ;;  %2697 = vmatmul.mubr.bf16.vlgmr.msra.gmra.mrb[8].mxu0 %v2137_v58 }
 0x16c   :  { %2737 = vmatmul.mubr.bf16.vlgmr.msra.gmra.mrb[8].mxu1 %v2139_v63  ;;  %3251 = vmatpush3.bf16.msra.mxu0 %v3354_v54  ;;  %v3138_v54 = vld [vmem:[%s4609_s8] ss:$0 sm:$0xff] }
 0x16d   :  { %3273 = vmatpush3.bf16.msra.mxu1 %v3355_v60  ;;  %3252 = vmatprep.subr.bf16.mxu0 %v3356_v61 }
 0x16e   :  { %3274 = vmatprep.subr.bf16.mxu1 %v3357_v0 }
 0x170   :  { %3253 = vmatpush3.bf16.msra.mxu0 %v3358_v1 }
 0x171   :  { %3275 = vmatpush3.bf16.msra.mxu1 %v3359_v2  ;;  %3254 = vmatprep.subr.bf16.mxu0 %v3360_v3 }
 0x172   :  { %3276 = vmatprep.subr.bf16.mxu1 %v3361_v62 }
 0x174   :  { %3255 = vmatpush3.bf16.msra.mxu0 %v3362_v4  ;;  %v2832_v4 = vld [vmem:[%s4613_s12] sm:$0x1] }
 0x175   :  { %3277 = vmatpush3.bf16.msra.mxu1 %v3363_v5  ;;  %3256 = vmatprep.subr.bf16.mxu0 %v3364_v6  ;;  %v2833_v5 = vadd.f32 1e-05, %v2832_v4 }
 0x176   :  { %3278 = vmatprep.subr.bf16.mxu1 %v3365_v7 }
 0x178   :  { %3257 = vmatpush3.bf16.msra.mxu0 %v3366_v40 }
 0x179   :  { %3279 = vmatpush3.bf16.msra.mxu1 %v3367_v9  ;;  %3258 = vmatprep.subr.bf16.mxu0 %v3368_v10 }
 0x17a   :  { %3280 = vmatprep.subr.bf16.mxu1 %v3369_v11 }
 0x17c   :  { %3259 = vmatpush3.bf16.msra.mxu0 %v3370_v17 }
 0x17d   :  { %3281 = vmatpush3.bf16.msra.mxu1 %v3371_v12  ;;  %3260 = vmatprep.subr.bf16.mxu0 %v3372_v13 }
 0x17e   :  { %3282 = vmatprep.subr.bf16.mxu1 %v3373_v14 }
 0x180   :  { %3261 = vmatpush3.bf16.msra.mxu0 %v3374_v21 }
 0x181   :  { %3283 = vmatpush3.bf16.msra.mxu1 %v3375_v15  ;;  %3262 = vmatprep.subr.bf16.mxu0 %v3376_v16  ;;  %v3203_v16 = vld [vmem:[%s4612_s11] ss:$0 sm:$0xff]  ;;  %s3433_s11 = smov [#allocation2]  }
 0x182   :  { %3284 = vmatprep.subr.bf16.mxu1 %v3377_v18  ;;  %s2874_s17 = sshll.u32 %s3433_s11, 4  ;;  %s2875_s17 = int_to_ptr.vmem [resolvable:$true] %s2874_s17 }
 0x183   :  { %p3413_p1 = scmp.lt.s32.totalorder %s2875_s17, %s2875_s17 }
 0x184   :  { %3263 = vmatpush3.bf16.msra.mxu0 %v3378_v29 }
 0x185   :  { %3285 = vmatpush3.bf16.msra.mxu1 %v3379_v19  ;;  %3264 = vmatprep.subr.bf16.mxu0 %v3380_v20  ;;  %v3204_v20 = vld [vmem:[%s4610_s9] ss:$0 sm:$0xff]  ;;  %s3408_s9 = scalar_lea.vmem %s2875_s17, 32 }
 0x186   :  { %3286 = vmatprep.subr.bf16.mxu1 %v3381_v22  ;;  %p3409_p0 = scmp.ne.s32.totalorder %s2875_s17, %s3408_s9  ;;  %p3414_p2 = scmp.lt.s32.totalorder %s3408_s9, %s3408_s9 }
 0x188   :  { %3265 = vmatpush3.bf16.msra.mxu0 %v3382_v23  ;;  %v3205_v23 = vld [vmem:[%s4611_s10] ss:$0 sm:$0xff]  ;;  %p3415_p3 = por %p3414_p2, %p3413_p1 }
 0x189   :  { %3287 = vmatpush3.bf16.msra.mxu1 %v3383_v24 }
 0x18a   :  { %p3416_p4 = pnand %p3415_p3, %p3409_p0 }
 0x1d8   :  { %v2040_v35 = vpop.f32.mrb[4].mxu0  ;;  %v2122_v37 = vpop.f32.mrb[4].mxu1 }
 0x1d9   :  { %v3298_v36 = vadd.f32 %v2040_v35, %v500_v30  ;;  %v2042_v38 = vpop.f32.mrb[5].mxu0  ;;  %v3300_v39 = vadd.f32 %v2122_v37, %v508_v31  ;;  %v2124_v43 = vpop.f32.mrb[5].mxu1 }
 0x1da   :  { %v3299_v42 = vadd.f32 %v2042_v38, %v504_v32  ;;  %v2044_v44 = vpop.f32.mrb[6].mxu0  ;;  %v3301_v45 = vadd.f32 %v2124_v43, %v512_v34  ;;  %v2126_v46 = vpop.f32.mrb[6].mxu1 }
 0x1db   :  { %3394 = vtanh.f32 %v3298_v36  ;;  %v2045_v41 = vpop.f32.mrb[7].mxu0  ;;  %v2127_v47 = vpop.f32.mrb[7].mxu1 }
 0x1dc   :  { %3396 = vtanh.f32 %v3300_v39 }
 0x1dd   :  { %3398 = vtanh.f32 %v3299_v42 }
 0x1de   :  { %3400 = vtanh.f32 %v3301_v45 }
 0x1df   :  { %3402 = vrsqrt.f32 %v2833_v5 }
 0x1e5   :  { %v3395_v8 = vpop.eup %3394 }
 0x1e6   :  { %v3397_v48 = vpop.eup %3396  ;;  %v2141_v55 = vpack.c.bf16 %v3395_v8, %v3395_v8 }
 0x1e7   :  { %v3399_v49 = vpop.eup %3398  ;;  %v2143_v52 = vpack.c.bf16 %v3397_v48, %v3397_v48 }
 0x1e8   :  { %v3401_v33 = vpop.eup %3400  ;;  %v2142_v56 = vpack.c.bf16 %v3399_v49, %v3399_v49 }
 0x1e9   :  { %v2144_v51 = vpack.c.bf16 %v3401_v33, %v3401_v33  ;;  %v3403_v17 = vpop.eup %3402 }
 0x1ea   :  { %2776 = vmatprep.mubr.bf16.mxu0 %v2142_v56  ;;  %v2839_v29 = vrot.slane %v3403_v17, %v3585_v50 }
 0x1eb   :  { %2816 = vmatprep.mubr.bf16.mxu1 %v2144_v51  ;;  %2777 = vmatmul.mubr.bf16.vlgmr.msra.gmra.mrb[12].mxu0 %v2141_v55 }
 0x1ec   :  { %2817 = vmatmul.mubr.bf16.vlgmr.msra.gmra.mrb[12].mxu1 %v2143_v52 }
 0x23e   :  { %v3222_v57 = vpop.f32.mrb[8].mxu0 }
 0x23f   :  { %v3244_v53 = vpop.f32.mrb[8].mxu1  ;;  %v3223_v58 = vpop.f32.mrb[9].mxu0 }
 0x240   :  { %v3224_v59 = vadd.f32 %v3223_v58, %v3222_v57  ;;  %v3245_v60 = vpop.f32.mrb[9].mxu1  ;;  %v3225_v61 = vpop.f32.mrb[10].mxu0 }
 0x241   :  { %v3246_v63 = vadd.f32 %v3245_v60, %v3244_v53  ;;  %v3247_v0 = vpop.f32.mrb[10].mxu1  ;;  %v3226_v1 = vpop.f32.mrb[11].mxu0 }
 0x242   :  { %v2699_v2 = vadd.f32 %v3224_v59, %v3138_v54  ;;  %v3248_v3 = vpop.f32.mrb[11].mxu1 }
 0x244   :  { %v2739_v62 = vadd.f32 %v3246_v63, %v2699_v2 }
 0x2be   :  { %v3266_v6 = vpop.f32.mrb[12].mxu0 }
 0x2bf   :  { %v3288_v7 = vpop.f32.mrb[12].mxu1  ;;  %v3267_v40 = vpop.f32.mrb[13].mxu0 }
 0x2c0   :  { %v3268_v9 = vadd.f32 %v3267_v40, %v3266_v6  ;;  %v3289_v10 = vpop.f32.mrb[13].mxu1  ;;  %v3269_v11 = vpop.f32.mrb[14].mxu0 }
 0x2c1   :  { %v3290_v12 = vadd.f32 %v3289_v10, %v3288_v7  ;;  %v3291_v13 = vpop.f32.mrb[14].mxu1  ;;  %v3270_v14 = vpop.f32.mrb[15].mxu0 }
 0x2c2   :  { %v2779_v21 = vadd.f32 %v3268_v9, %v2739_v62  ;;  %v3292_v15 = vpop.f32.mrb[15].mxu1 }
 0x2c4   :  { %v2819_v18 = vadd.f32 %v3290_v12, %v2779_v21 }
 0x2c6   :  { %v2831_v19 = vsub.f32 %v2819_v18, %v3203_v16 }
 0x2c8   :  { %v2841_v22 = vmul.f32 %v2839_v29, %v2831_v19 }
 0x2ca   :  { %v2849_v24 = vmul.f32 %v3204_v20, %v2841_v22 }
 0x2cc   :  { %v2857_v25 = vadd.f32 %v3205_v23, %v2849_v24 }
 0x2ce   :  { %3404 = vtanh.f32 %v2857_v25 }
 0x2d8   :  { %v3405_v26 = vpop.eup %3404 }
 0x2d9   :  { %v2859_v27 = vmul.f32 %v3405_v26, %v3405_v26 }
 0x2db   :  { %v2861_v28 = vsel %vm2860_vm0, %v2859_v27, 0.0 }
 0x2dc   :  { %2862 = vadd.xlane.f32.xlu0 %v2861_v28 }
 0x369   :  { %v2863_v30 = vpop.xlane.xlu0 %2862 }
 0x36a   :  { %v2864_v50 = vmax.f32 %v2863_v30, 1e-24 }
 0x36c   :  { %3406 = vrsqrt.f32 %v2864_v50 }
 0x376   :  { %v3407_v31 = vpop.eup %3406 }
 0x377   :  { %v2866_v32 = vmul.f32 %v3407_v31, %v3405_v26 }
 0x379   :  { %2867 = vst [vmem:[#allocation2] sm:$0x3] %v2866_v32 }
 0x37a   :  { %3419 = shalt.err (!%p3416_p4)
}
 0x37b   :  { %s3420_s18 = scalar_lea.hbm %s4614_s13, 32 }
 0x37c   :  { %p3421_p5 = scmp.ne.s32.totalorder %s4614_s13, %s3420_s18  ;;  %p3424_p6 = scmp.lt.u32.totalorder %s3420_s18, %s4614_s13 }
 0x37e   :  { %p3426_p7 = pnand %p3424_p6, %p3421_p5 }
 0x380   :  { %3429 = shalt.err (!%p3426_p7)
}
 0x381   :  { %2877 = dma.vmem_to_hbm [thread:$0]  %s2875_s17, 32, %s4614_s13, [#allocation3]  }
 0x382   :  { %3430 = dma.done.wait [#allocation3], 32  }
 0x383   :  { %3431 = vsyncadd [#allocation3], 4294967264 }
 0x384   :  { %2881 = vsyncpa [#allocation3], 1 }

</bundles_post_ra>
